<compile_context>
chip_gen: v5e
topology: v5e:2x2
jax: 0.10.0
libtpu: 0.0.40
codegen_flags: <defaults>
</compile_context>

<pallas_src>
import jax
import jax.numpy as jnp
import numpy as np
from jax.experimental import pallas as pl
from jax.experimental.pallas import tpu as pltpu


# ---------------------------------------------------------------------------
# Kernel: one full decoder step, vocab-tiled output projection on the grid axis
# ---------------------------------------------------------------------------
def decoder_kernel(
    # scalar prefetch (SMEM)
    tok_ref,        # (B,)  int32 token ids
    # inputs
    h_ref,          # (B, Hd)       f32  previous hidden state
    c_ref,          # (B, Hd)       f32  previous cell state
    enc_ref,        # (B, S, 2He)   f32  encoder outputs (batch-major)
    mask_ref,       # (B, S)        f32  attention mask (1 keep / 0 masked)
    emb_ref,        # (V, 1, E)     bf16 embedding table (VMEM resident)
    aw_h_ref,       # (Hd, Hd)      bf16 attention weight, hidden slice
    aw_e_ref,       # (2He, Hd)     bf16 attention weight, encoder slice
    ab_ref,         # (1, Hd)       f32  attention bias
    av_ref,         # (1, Hd)       f32  attention "v" vector
    wih_e_ref,      # (E, 4Hd)      bf16 LSTM input->gates, embedded slice
    wih_w_ref,      # (2He, 4Hd)    bf16 LSTM input->gates, weighted slice
    whh_ref,        # (Hd, 4Hd)     bf16 LSTM hidden->gates
    b_ref,          # (1, 4Hd)      f32  LSTM bias (b_ih + b_hh)
    fcw_ref,        # (Hd+2He+E, TILE_V) bf16 fused fc_out weight (vocab tile j)
    fcb_ref,        # (1, TILE_V)   f32  fc_out bias (vocab tile j)
    # outputs
    pred_ref,       # (B, TILE_V)   f32
    h_out_ref,      # (B, Hd)       f32
    c_out_ref,      # (B, Hd)       f32
    a_out_ref,      # (B, S)        f32
    # scratch
    act_buf,        # (B, Hd+2He+E) bf16  [h_new | weighted | embedded]
):
    j = pl.program_id(0)
    B, S, E2 = enc_ref.shape
    Hd = h_ref.shape[1]
    bf16 = jnp.bfloat16
    f32 = jnp.float32

    # --- grid step 0: embedding lookup + attention + LSTM cell (results kept in scratch) ---
    @pl.when(j == 0)
    def _recurrent_step():
        # Embedding lookup: B dynamic-row reads from the VMEM-resident table.
        # Dropout == identity (eval mode).
        rows = [emb_ref[tok_ref[i]].astype(f32) for i in range(B)]     # each (1, E)
        embedded_f32 = jnp.concatenate(rows, axis=0)                   # (B, E) f32
        embedded = embedded_f32.astype(bf16)                           # cast once

        hidden = h_ref[...]                                            # (B, Hd) f32
        enc = enc_ref[...]                                             # (B, S, 2He) f32

        # ---- Bahdanau attention (split matmuls; hidden projected once, no lane concat) ----
        hid_proj = jnp.dot(hidden.astype(bf16), aw_h_ref[...],
                           preferred_element_type=f32)                 # (B, Hd)
        enc_proj = jnp.dot(enc.reshape(B * S, E2).astype(bf16), aw_e_ref[...],
                           preferred_element_type=f32).reshape(B, S, Hd)
        energy = jnp.tanh(enc_proj + hid_proj[:, None, :] + ab_ref[...])   # (B, S, Hd)
        scores = jnp.sum(energy * av_ref[...], axis=2)                     # (B, S)

        scores = jnp.where(mask_ref[...] > 0, scores, jnp.float32(-1e10))
        scores = scores - jnp.max(scores, axis=1, keepdims=True)
        ex = jnp.exp(scores)
        a = ex / jnp.sum(ex, axis=1, keepdims=True)       # exact softmax (correctness fix)
        a_out_ref[...] = a

        # ---- weighted context: bmm(a.unsqueeze(1), encoder_outputs) ----
        # TODO(synk): for large S move this onto the MXU (batched dot_general); at S=8 the
        #             broadcast+sum form is negligible.
        weighted = jnp.sum(a[:, :, None] * enc, axis=1)                    # (B, 2He) f32

        # ---- single-step LSTM cell (split input->gate matmuls; no rnn_in concat) ----
        gates = (
            jnp.dot(embedded, wih_e_ref[...], preferred_element_type=f32)
            + jnp.dot(weighted.astype(bf16), wih_w_ref[...], preferred_element_type=f32)
            + jnp.dot(hidden.astype(bf16), whh_ref[...], preferred_element_type=f32)
            + b_ref[...]
        )                                                                  # (B, 4Hd) f32
        i_g = jax.nn.sigmoid(gates[:, 0 * Hd:1 * Hd])
        f_g = jax.nn.sigmoid(gates[:, 1 * Hd:2 * Hd])
        g_g = jnp.tanh(gates[:, 2 * Hd:3 * Hd])
        o_g = jax.nn.sigmoid(gates[:, 3 * Hd:4 * Hd])
        c_new = f_g * c_ref[...] + i_g * g_g
        h_new = o_g * jnp.tanh(c_new)
        h_out_ref[...] = h_new
        c_out_ref[...] = c_new

        # fc_out input [h_new | weighted | embedded], cast to bf16 exactly once.
        act_buf[...] = jnp.concatenate(
            [h_new.astype(bf16), weighted.astype(bf16), embedded], axis=1)

    # --- every grid step: one vocab tile, a SINGLE fused matmul + bias (lane-dense store) ---
    pred_ref[...] = (
        jnp.dot(act_buf[...], fcw_ref[...], preferred_element_type=f32) + fcb_ref[...]
    )


# ---------------------------------------------------------------------------
# Parameter preparation
# ---------------------------------------------------------------------------
def prepare_kernel_params(p, *, Hd, E, E2):
    """Split attention / LSTM input weights (so the kernel never concatenates activations for
    them), keep the fc_out weight fused (one matmul per vocab tile), and store all matmul
    weights + the embedding table in bf16 (f32 MXU accumulation).  Biases stay f32."""
    bf = jnp.bfloat16
    f32 = jnp.float32
    V = p["emb"].shape[0]
    return {
        "emb":      p["emb"].astype(bf).reshape(V, 1, E),   # (V,1,E): dynamic leading-dim reads
        "attn_w_h": p["attn_w"][:Hd].astype(bf),
        "attn_w_e": p["attn_w"][Hd:].astype(bf),
        "attn_b":   p["attn_b"].astype(f32),
        "attn_v":   p["attn_v"].astype(f32),
        "w_ih_e":   p["w_ih"][:E].astype(bf),
        "w_ih_w":   p["w_ih"][E:].astype(bf),
        "w_hh":     p["w_hh"].astype(bf),
        "b":        p["b"].astype(f32),
        "fc_w":     p["fc_w"].astype(bf),                   # fused (Hd+E2+E, V)
        "fc_b":     p["fc_b"].astype(f32),
    }


# ---------------------------------------------------------------------------
# Wrapper
# ---------------------------------------------------------------------------
@jax.jit
def decoder_forward(tokens, hidden, cell, encoder_outputs, mask, kp):
    """One decoder step.

    tokens: (B,) int32; hidden/cell: (B, Hd) f32; encoder_outputs: (S, B, 2*He) f32
    (PyTorch seq-major convention); mask: (B, S); kp: prepared kernel params."""
    enc_bmaj = jnp.transpose(encoder_outputs, (1, 0, 2)).astype(jnp.float32)
    B, S, E2 = enc_bmaj.shape
    Hd = hidden.shape[1]
    V, _, E = kp["emb"].shape
    D = Hd + E2 + E
    assert kp["fc_w"].shape == (D, V)

    # ---- vocab tile: as large as a v7x-safe VMEM budget allows, multiple of 128 ----
    # fused fc weight (bf16) + fc bias (f32) + pred tile (f32), each double-buffered.
    per_col_bytes = 2 * (D * 2 + 4 + B * 4)
    stream_budget = 24 * 1024 * 1024
    cap = max(128, (stream_budget // per_col_bytes) // 128 * 128)
    tile_v = V if V <= cap else cap
    if V % tile_v != 0:
        tile_v = V   # TODO(synk): ragged last vocab tile for V not a multiple of the cap
    n_v = V // tile_v

    # ---- VMEM limit derived from the actual footprint (not a blanket constant) ----
    const_bytes = 2 * (
        2 * B * Hd * 4                        # hidden, cell
        + B * S * E2 * 4 + B * S * 4          # encoder outputs, mask
        + (Hd + E2) * Hd * 2 + 2 * Hd * 4     # attention weights / bias / v
        + (E + E2 + Hd) * 4 * Hd * 2 + 4 * Hd * 4   # LSTM weights / bias
        + V * 16 * E * 2                      # embedding table (sublane-padded bf16)
    )
    stream_bytes = 2 * (D * tile_v * 2 + tile_v * 4 + B * tile_v * 4)
    out_bytes = 2 * (2 * B * Hd * 4 + B * S * 4)
    scratch_bytes = B * D * 2
    vmem_limit = int(min(const_bytes + stream_bytes + out_bytes + scratch_bytes + (4 << 20),
                         60 * 1024 * 1024))

    def const_spec(shape):
        nd = len(shape)
        return pl.BlockSpec(shape, lambda j, tok, _nd=nd: (0,) * _nd)

    def vtile(rows):
        return pl.BlockSpec((rows, tile_v), lambda j, tok: (0, j))

    in_specs = [
        const_spec((B, Hd)),                 # hidden
        const_spec((B, Hd)),                 # cell
        const_spec((B, S, E2)),              # encoder outputs (batch-major)
        const_spec((B, S)),                  # mask
        const_spec((V, 1, E)),               # embedding table (VMEM resident, small)
        const_spec((Hd, Hd)),                # attn_w_h
        const_spec((E2, Hd)),                # attn_w_e
        const_spec((1, Hd)),                 # attn_b
        const_spec((1, Hd)),                 # attn_v
        const_spec((E, 4 * Hd)),             # w_ih_e
        const_spec((E2, 4 * Hd)),            # w_ih_w
        const_spec((Hd, 4 * Hd)),            # w_hh
        const_spec((1, 4 * Hd)),             # lstm bias
        vtile(D),                            # fused fc_out weight (streamed over vocab tiles)
        vtile(1),                            # fc_out bias
    ]
    out_specs = [
        vtile(B),                            # prediction: lane-dense stores
        const_spec((B, Hd)),                 # hidden out
        const_spec((B, Hd)),                 # cell out
        const_spec((B, S)),                  # attention weights
    ]
    out_shape = (
        jax.ShapeDtypeStruct((B, V), jnp.float32),
        jax.ShapeDtypeStruct((B, Hd), jnp.float32),
        jax.ShapeDtypeStruct((B, Hd), jnp.float32),
        jax.ShapeDtypeStruct((B, S), jnp.float32),
    )
    scratch_shapes = [pltpu.VMEM((B, D), jnp.bfloat16)]

    inputs = (
        hidden.astype(jnp.float32), cell.astype(jnp.float32), enc_bmaj,
        mask.astype(jnp.float32),
        kp["emb"], kp["attn_w_h"], kp["attn_w_e"], kp["attn_b"], kp["attn_v"],
        kp["w_ih_e"], kp["w_ih_w"], kp["w_hh"], kp["b"],
        kp["fc_w"], kp["fc_b"],
    )

    # Advisory cost estimate so XLA can overlap surrounding ops with the kernel's weight DMA.
    act_bytes = sum(int(x.size) * x.dtype.itemsize for x in inputs[:4])
    w_bytes = sum(int(kp[k].size) * kp[k].dtype.itemsize for k in (
        "emb", "attn_w_h", "attn_w_e", "attn_b", "attn_v",
        "w_ih_e", "w_ih_w", "w_hh", "b", "fc_w", "fc_b"))
    out_bytes_hbm = (B * V + 2 * B * Hd + B * S) * 4
    cost = pl.CostEstimate(
        flops=int(2 * B * Hd * Hd + 2 * B * S * E2 * Hd + 2 * B * S * Hd + 2 * B * S * E2
                  + 2 * B * (E + E2 + Hd) * 4 * Hd + 2 * B * D * V),
        transcendentals=int(B * S * Hd + B * S + 5 * B * Hd),
        bytes_accessed=int(act_bytes + w_bytes + out_bytes_hbm),
    )

    grid_spec = pltpu.PrefetchScalarGridSpec(
        num_scalar_prefetch=1,               # token ids -> SMEM, drive the embedding lookup
        grid=(n_v,),
        in_specs=in_specs,
        out_specs=out_specs,
        scratch_shapes=scratch_shapes,
    )
    return pl.pallas_call(
        decoder_kernel,
        out_shape=out_shape,
        grid_spec=grid_spec,
        compiler_params=pltpu.CompilerParams(
            # The vocab-tile axis carries attention/LSTM results in scratch from step 0, so it
            # must remain "arbitrary" (see TODO on a split/parallel v7x variant).
            dimension_semantics=("arbitrary",),
            vmem_limit_bytes=vmem_limit,
        ),
        cost_estimate=cost,
    )(tokens.astype(jnp.int32), *inputs)


# ---------------------------------------------------------------------------
# Pure-JAX reference (mirrors the kernel's numerics exactly: bf16 matmul inputs,
# f32 accumulation, exact softmax, same weighted-sum formulation)
# ---------------------------------------------------------------------------
def decoder_reference(tokens, hidden, cell, encoder_outputs, mask, kp):
    bf = jnp.bfloat16
    f32 = jnp.float32
    enc = jnp.transpose(encoder_outputs, (1, 0, 2)).astype(f32)
    B, S, E2 = enc.shape
    Hd = hidden.shape[1]
    emb2d = kp["emb"].reshape(kp["emb"].shape[0], -1)                    # (V, E) bf16
    embedded = emb2d[tokens]                                             # (B, E) bf16
    hid_proj = jnp.dot(hidden.astype(bf), kp["attn_w_h"], preferred_element_type=f32)
    enc_proj = jnp.dot(enc.reshape(B * S, E2).astype(bf), kp["attn_w_e"],
                       preferred_element_type=f32).reshape(B, S, Hd)
    energy = jnp.tanh(enc_proj + hid_proj[:, None, :] + kp["attn_b"])
    scores = jnp.sum(energy * kp["attn_v"], axis=2)
    scores = jnp.where(mask > 0, scores, -1e10)
    scores = scores - jnp.max(scores, axis=1, keepdims=True)
    ex = jnp.exp(scores)
    a = ex / jnp.sum(ex, axis=1, keepdims=True)
    weighted = jnp.sum(a[:, :, None] * enc, axis=1)
    gates = (jnp.dot(embedded, kp["w_ih_e"], preferred_element_type=f32)
             + jnp.dot(weighted.astype(bf), kp["w_ih_w"], preferred_element_type=f32)
             + jnp.dot(hidden.astype(bf), kp["w_hh"], preferred_element_type=f32)
             + kp["b"])
    i_g = jax.nn.sigmoid(gates[:, 0 * Hd:1 * Hd])
    f_g = jax.nn.sigmoid(gates[:, 1 * Hd:2 * Hd])
    g_g = jnp.tanh(gates[:, 2 * Hd:3 * Hd])
    o_g = jax.nn.sigmoid(gates[:, 3 * Hd:4 * Hd])
    c_new = f_g * cell + i_g * g_g
    h_new = o_g * jnp.tanh(c_new)
    act = jnp.concatenate([h_new.astype(bf), weighted.astype(bf), embedded], axis=1)
    pred = jnp.dot(act, kp["fc_w"], preferred_element_type=f32) + kp["fc_b"]
    return pred, h_new, c_new, a


# ---------------------------------------------------------------------------
# Main
# ---------------------------------------------------------------------------
if __name__ == "__main__":
    # Model dimensions (lane/sublane friendly).  NOTE: B=8 keeps MXU utilization low by
    # construction; only wrapper-level batching of beams/requests or multi-step unrolling
    # can raise it (outside the single-step module interface).
    V = 256        # output_dim (vocab)
    E = 128        # embedding_dim
    He = 64        # encoder_hidden_dim -> bidirectional 2*He = 128
    Hd = 128       # decoder_hidden_dim
    B = 8          # batch
    S = 8          # source sequence length
    E2 = 2 * He

    key = jax.random.PRNGKey(0)
    ks = jax.random.split(key, 16)

    # PyTorch-layout weights pre-transposed to (in_features, out_features).
    params = {
        "emb":    jax.random.normal(ks[0], (V, E), jnp.float32) * 0.1,
        "attn_w": jax.random.normal(ks[1], (Hd + E2, Hd), jnp.float32) * 0.1,
        "attn_b": jax.random.normal(ks[2], (1, Hd), jnp.float32) * 0.1,
        "attn_v": jax.random.normal(ks[3], (1, Hd), jnp.float32) * 0.1,
        "w_ih":   jax.random.normal(ks[4], (E + E2, 4 * Hd), jnp.float32) * 0.1,
        "w_hh":   jax.random.normal(ks[5], (Hd, 4 * Hd), jnp.float32) * 0.1,
        "b":      jax.random.normal(ks[6], (1, 4 * Hd), jnp.float32) * 0.1,
        "fc_w":   jax.random.normal(ks[7], (Hd + E2 + E, V), jnp.float32) * 0.1,
        "fc_b":   jax.random.normal(ks[8], (1, V), jnp.float32) * 0.1,
    }
    kp = prepare_kernel_params(params, Hd=Hd, E=E, E2=E2)

    tokens = jax.random.randint(ks[9], (B,), 0, V, dtype=jnp.int32)
    hidden = jax.random.normal(ks[10], (B, Hd), jnp.float32) * 0.5
    cell = jax.random.normal(ks[11], (B, Hd), jnp.float32) * 0.5
    encoder_outputs = jax.random.normal(ks[12], (S, B, E2), jnp.float32) * 0.5
    mask = jnp.ones((B, S), jnp.float32)   # forward(..., mask=None) -> keep everything

    outs = jax.block_until_ready(decoder_forward(tokens, hidden, cell, encoder_outputs, mask, kp))
    refs = decoder_reference(tokens, hidden, cell, encoder_outputs, mask, kp)
    # Tolerance covers bf16 matmul inputs and EUP-vs-XLA transcendental ULP differences.
    for got, ref in zip(outs, refs):
        np.testing.assert_allclose(np.asarray(got), np.asarray(ref, dtype=np.float32),
                                   rtol=1e-2, atol=2e-3)

    print("KERNEL_OK")
</pallas_src>

<mosaic_0001>
module attributes {stable_mosaic.version = 11 : i64} {
  func.func @decoder_kernel(%arg0: i32, %arg1: memref<8xi32, #tpu.memory_space<smem>>, %arg2: memref<8x128xf32, #tpu.memory_space<vmem>>, %arg3: memref<8x128xf32, #tpu.memory_space<vmem>>, %arg4: memref<8x8x128xf32, #tpu.memory_space<vmem>>, %arg5: memref<8x8xf32, #tpu.memory_space<vmem>>, %arg6: memref<256x1x128xbf16, #tpu.memory_space<vmem>>, %arg7: memref<128x128xbf16, #tpu.memory_space<vmem>>, %arg8: memref<128x128xbf16, #tpu.memory_space<vmem>>, %arg9: memref<1x128xf32, #tpu.memory_space<vmem>>, %arg10: memref<1x128xf32, #tpu.memory_space<vmem>>, %arg11: memref<128x512xbf16, #tpu.memory_space<vmem>>, %arg12: memref<128x512xbf16, #tpu.memory_space<vmem>>, %arg13: memref<128x512xbf16, #tpu.memory_space<vmem>>, %arg14: memref<1x512xf32, #tpu.memory_space<vmem>>, %arg15: memref<384x256xbf16, #tpu.memory_space<vmem>>, %arg16: memref<1x256xf32, #tpu.memory_space<vmem>>, %arg17: memref<8x256xf32, #tpu.memory_space<vmem>>, %arg18: memref<8x128xf32, #tpu.memory_space<vmem>>, %arg19: memref<8x128xf32, #tpu.memory_space<vmem>>, %arg20: memref<8x8xf32, #tpu.memory_space<vmem>>, %arg21: memref<8x384xbf16, #tpu.memory_space<vmem>>) attributes {dimension_semantics = [#tpu.dimension_semantics<arbitrary>], iteration_bounds = array<i64: 1>, scalar_prefetch = 1 : i64, scratch_operands = 1 : i64, tpu.core_type = #tpu.core_type<tc>, window_params = [{pipeline_mode = #tpu.pipeline_mode<synchronous>, transform_indices = @transform_0, window_bounds = array<i64: 8, 128>}, {pipeline_mode = #tpu.pipeline_mode<synchronous>, transform_indices = @transform_1, window_bounds = array<i64: 8, 128>}, {pipeline_mode = #tpu.pipeline_mode<synchronous>, transform_indices = @transform_2, window_bounds = array<i64: 8, 8, 128>}, {pipeline_mode = #tpu.pipeline_mode<synchronous>, transform_indices = @transform_3, window_bounds = array<i64: 8, 8>}, {pipeline_mode = #tpu.pipeline_mode<synchronous>, transform_indices = @transform_4, window_bounds = array<i64: 256, 1, 128>}, {pipeline_mode = #tpu.pipeline_mode<synchronous>, transform_indices = @transform_5, window_bounds = array<i64: 128, 128>}, {pipeline_mode = #tpu.pipeline_mode<synchronous>, transform_indices = @transform_6, window_bounds = array<i64: 128, 128>}, {pipeline_mode = #tpu.pipeline_mode<synchronous>, transform_indices = @transform_7, window_bounds = array<i64: 1, 128>}, {pipeline_mode = #tpu.pipeline_mode<synchronous>, transform_indices = @transform_8, window_bounds = array<i64: 1, 128>}, {pipeline_mode = #tpu.pipeline_mode<synchronous>, transform_indices = @transform_9, window_bounds = array<i64: 128, 512>}, {pipeline_mode = #tpu.pipeline_mode<synchronous>, transform_indices = @transform_10, window_bounds = array<i64: 128, 512>}, {pipeline_mode = #tpu.pipeline_mode<synchronous>, transform_indices = @transform_11, window_bounds = array<i64: 128, 512>}, {pipeline_mode = #tpu.pipeline_mode<synchronous>, transform_indices = @transform_12, window_bounds = array<i64: 1, 512>}, {transform_indices = @transform_13, window_bounds = array<i64: 384, 256>}, {transform_indices = @transform_14, window_bounds = array<i64: 1, 256>}, {transform_indices = @transform_15, window_bounds = array<i64: 8, 256>}, {pipeline_mode = #tpu.pipeline_mode<synchronous>, transform_indices = @transform_16, window_bounds = array<i64: 8, 128>}, {pipeline_mode = #tpu.pipeline_mode<synchronous>, transform_indices = @transform_17, window_bounds = array<i64: 8, 128>}, {pipeline_mode = #tpu.pipeline_mode<synchronous>, transform_indices = @transform_18, window_bounds = array<i64: 8, 8>}]} {
    %c0_i32 = arith.constant 0 : i32
    %0 = arith.cmpi eq, %arg0, %c0_i32 : i32
    %1 = arith.extui %0 : i1 to i32
    %c0_i32_0 = arith.constant 0 : i32
    %2 = arith.cmpi ne, %1, %c0_i32_0 : i32
    scf.if %2 {
      %c0_8 = arith.constant 0 : index
      %10 = memref.load %arg1[%c0_8] : memref<8xi32, #tpu.memory_space<smem>>
      %11 = arith.index_cast %10 : i32 to index
      %c0_9 = arith.constant 0 : index
      %c0_10 = arith.constant 0 : index
      %12 = vector.load %arg6[%11, %c0_9, %c0_10] : memref<256x1x128xbf16, #tpu.memory_space<vmem>>, vector<1x1x128xbf16>
      %13 = vector.shape_cast %12 : vector<1x1x128xbf16> to vector<1x128xbf16>
      %14 = arith.extf %13 : vector<1x128xbf16> to vector<1x128xf32>
      %c1 = arith.constant 1 : index
      %15 = memref.load %arg1[%c1] : memref<8xi32, #tpu.memory_space<smem>>
      %16 = arith.index_cast %15 : i32 to index
      %c0_11 = arith.constant 0 : index
      %c0_12 = arith.constant 0 : index
      %17 = vector.load %arg6[%16, %c0_11, %c0_12] : memref<256x1x128xbf16, #tpu.memory_space<vmem>>, vector<1x1x128xbf16>
      %18 = vector.shape_cast %17 : vector<1x1x128xbf16> to vector<1x128xbf16>
      %19 = arith.extf %18 : vector<1x128xbf16> to vector<1x128xf32>
      %c2 = arith.constant 2 : index
      %20 = memref.load %arg1[%c2] : memref<8xi32, #tpu.memory_space<smem>>
      %21 = arith.index_cast %20 : i32 to index
      %c0_13 = arith.constant 0 : index
      %c0_14 = arith.constant 0 : index
      %22 = vector.load %arg6[%21, %c0_13, %c0_14] : memref<256x1x128xbf16, #tpu.memory_space<vmem>>, vector<1x1x128xbf16>
      %23 = vector.shape_cast %22 : vector<1x1x128xbf16> to vector<1x128xbf16>
      %24 = arith.extf %23 : vector<1x128xbf16> to vector<1x128xf32>
      %c3 = arith.constant 3 : index
      %25 = memref.load %arg1[%c3] : memref<8xi32, #tpu.memory_space<smem>>
      %26 = arith.index_cast %25 : i32 to index
      %c0_15 = arith.constant 0 : index
      %c0_16 = arith.constant 0 : index
      %27 = vector.load %arg6[%26, %c0_15, %c0_16] : memref<256x1x128xbf16, #tpu.memory_space<vmem>>, vector<1x1x128xbf16>
      %28 = vector.shape_cast %27 : vector<1x1x128xbf16> to vector<1x128xbf16>
      %29 = arith.extf %28 : vector<1x128xbf16> to vector<1x128xf32>
      %c4 = arith.constant 4 : index
      %30 = memref.load %arg1[%c4] : memref<8xi32, #tpu.memory_space<smem>>
      %31 = arith.index_cast %30 : i32 to index
      %c0_17 = arith.constant 0 : index
      %c0_18 = arith.constant 0 : index
      %32 = vector.load %arg6[%31, %c0_17, %c0_18] : memref<256x1x128xbf16, #tpu.memory_space<vmem>>, vector<1x1x128xbf16>
      %33 = vector.shape_cast %32 : vector<1x1x128xbf16> to vector<1x128xbf16>
      %34 = arith.extf %33 : vector<1x128xbf16> to vector<1x128xf32>
      %c5 = arith.constant 5 : index
      %35 = memref.load %arg1[%c5] : memref<8xi32, #tpu.memory_space<smem>>
      %36 = arith.index_cast %35 : i32 to index
      %c0_19 = arith.constant 0 : index
      %c0_20 = arith.constant 0 : index
      %37 = vector.load %arg6[%36, %c0_19, %c0_20] : memref<256x1x128xbf16, #tpu.memory_space<vmem>>, vector<1x1x128xbf16>
      %38 = vector.shape_cast %37 : vector<1x1x128xbf16> to vector<1x128xbf16>
      %39 = arith.extf %38 : vector<1x128xbf16> to vector<1x128xf32>
      %c6 = arith.constant 6 : index
      %40 = memref.load %arg1[%c6] : memref<8xi32, #tpu.memory_space<smem>>
      %41 = arith.index_cast %40 : i32 to index
      %c0_21 = arith.constant 0 : index
      %c0_22 = arith.constant 0 : index
      %42 = vector.load %arg6[%41, %c0_21, %c0_22] : memref<256x1x128xbf16, #tpu.memory_space<vmem>>, vector<1x1x128xbf16>
      %43 = vector.shape_cast %42 : vector<1x1x128xbf16> to vector<1x128xbf16>
      %44 = arith.extf %43 : vector<1x128xbf16> to vector<1x128xf32>
      %c7 = arith.constant 7 : index
      %45 = memref.load %arg1[%c7] : memref<8xi32, #tpu.memory_space<smem>>
      %46 = arith.index_cast %45 : i32 to index
      %c0_23 = arith.constant 0 : index
      %c0_24 = arith.constant 0 : index
      %47 = vector.load %arg6[%46, %c0_23, %c0_24] : memref<256x1x128xbf16, #tpu.memory_space<vmem>>, vector<1x1x128xbf16>
      %48 = vector.shape_cast %47 : vector<1x1x128xbf16> to vector<1x128xbf16>
      %49 = arith.extf %48 : vector<1x128xbf16> to vector<1x128xf32>
      %50 = tpu.concatenate %14, %19, %24, %29, %34, %39, %44, %49 in 0 : vector<1x128xf32>, vector<1x128xf32>, vector<1x128xf32>, vector<1x128xf32>, vector<1x128xf32>, vector<1x128xf32>, vector<1x128xf32>, vector<1x128xf32> -> vector<8x128xf32>
      %51 = arith.truncf %50 : vector<8x128xf32> to vector<8x128xbf16>
      %c0_25 = arith.constant 0 : index
      %c0_26 = arith.constant 0 : index
      %52 = vector.load %arg2[%c0_25, %c0_26] : memref<8x128xf32, #tpu.memory_space<vmem>>, vector<8x128xf32>
      %c0_27 = arith.constant 0 : index
      %c0_28 = arith.constant 0 : index
      %c0_29 = arith.constant 0 : index
      %53 = vector.load %arg4[%c0_27, %c0_28, %c0_29] : memref<8x8x128xf32, #tpu.memory_space<vmem>>, vector<8x8x128xf32>
      %54 = arith.truncf %52 : vector<8x128xf32> to vector<8x128xbf16>
      %c0_30 = arith.constant 0 : index
      %c0_31 = arith.constant 0 : index
      %55 = vector.load %arg7[%c0_30, %c0_31] : memref<128x128xbf16, #tpu.memory_space<vmem>>, vector<128x128xbf16>
      %cst_32 = arith.constant dense<0.000000e+00> : vector<8x128xf32>
      %56 = tpu.matmul %54, %55, %cst_32 {dimension_numbers = #tpu.dot_dimension_numbers<[1], [0], [0], [1], [0, 0, 1, 1], [], []>} : vector<8x128xbf16>, vector<128x128xbf16>, vector<8x128xf32> -> vector<8x128xf32>
      %57 = vector.shape_cast %53 : vector<8x8x128xf32> to vector<64x128xf32>
      %58 = arith.truncf %57 : vector<64x128xf32> to vector<64x128xbf16>
      %c0_33 = arith.constant 0 : index
      %c0_34 = arith.constant 0 : index
      %59 = vector.load %arg8[%c0_33, %c0_34] : memref<128x128xbf16, #tpu.memory_space<vmem>>, vector<128x128xbf16>
      %cst_35 = arith.constant dense<0.000000e+00> : vector<64x128xf32>
      %60 = tpu.matmul %58, %59, %cst_35 {dimension_numbers = #tpu.dot_dimension_numbers<[1], [0], [0], [1], [0, 0, 1, 1], [], []>} : vector<64x128xbf16>, vector<128x128xbf16>, vector<64x128xf32> -> vector<64x128xf32>
      %61 = vector.shape_cast %60 : vector<64x128xf32> to vector<8x8x128xf32>
      %62 = vector.shape_cast %56 : vector<8x128xf32> to vector<8x1x128xf32>
      %63 = vector.broadcast %62 : vector<8x1x128xf32> to vector<8x8x128xf32>
      %64 = arith.addf %61, %63 : vector<8x8x128xf32>
      %c0_36 = arith.constant 0 : index
      %c0_37 = arith.constant 0 : index
      %65 = vector.load %arg9[%c0_36, %c0_37] : memref<1x128xf32, #tpu.memory_space<vmem>>, vector<1x128xf32>
      %66 = vector.shape_cast %65 : vector<1x128xf32> to vector<1x1x128xf32>
      %67 = vector.broadcast %66 : vector<1x1x128xf32> to vector<8x8x128xf32>
      %68 = arith.addf %64, %67 : vector<8x8x128xf32>
      %69 = math.tanh %68 : vector<8x8x128xf32>
      %c0_38 = arith.constant 0 : index
      %c0_39 = arith.constant 0 : index
      %70 = vector.load %arg10[%c0_38, %c0_39] : memref<1x128xf32, #tpu.memory_space<vmem>>, vector<1x128xf32>
      %71 = vector.shape_cast %70 : vector<1x128xf32> to vector<1x1x128xf32>
      %72 = vector.broadcast %71 : vector<1x1x128xf32> to vector<8x8x128xf32>
      %73 = arith.mulf %69, %72 : vector<8x8x128xf32>
      %cst_40 = arith.constant dense<0.000000e+00> : vector<8x8xf32>
      %74 = vector.multi_reduction <add>, %73, %cst_40 [2] : vector<8x8x128xf32> to vector<8x8xf32>
      %c0_41 = arith.constant 0 : index
      %c0_42 = arith.constant 0 : index
      %75 = vector.load %arg5[%c0_41, %c0_42] : memref<8x8xf32, #tpu.memory_space<vmem>>, vector<8x8xf32>
      %cst_43 = arith.constant 0.000000e+00 : f32
      %76 = vector.broadcast %cst_43 : f32 to vector<8x8xf32>
      %77 = arith.cmpf ogt, %75, %76 : vector<8x8xf32>
      %cst_44 = arith.constant -1.000000e+10 : f32
      %78 = vector.broadcast %cst_44 : f32 to vector<8x8xf32>
      %79 = arith.select %77, %74, %78 : vector<8x8xi1>, vector<8x8xf32>
      %cst_45 = arith.constant dense<0xFF800000> : vector<8xf32>
      %80 = vector.multi_reduction <maximumf>, %79, %cst_45 [1] : vector<8x8xf32> to vector<8xf32>
      %81 = vector.shape_cast %80 : vector<8xf32> to vector<8x1xf32>
      %82 = vector.broadcast %81 : vector<8x1xf32> to vector<8x8xf32>
      %83 = arith.subf %79, %82 : vector<8x8xf32>
      %84 = math.exp %83 : vector<8x8xf32>
      %cst_46 = arith.constant dense<0.000000e+00> : vector<8xf32>
      %85 = vector.multi_reduction <add>, %84, %cst_46 [1] : vector<8x8xf32> to vector<8xf32>
      %86 = vector.shape_cast %85 : vector<8xf32> to vector<8x1xf32>
      %87 = vector.broadcast %86 : vector<8x1xf32> to vector<8x8xf32>
      %88 = arith.divf %84, %87 : vector<8x8xf32>
      %c0_47 = arith.constant 0 : index
      %c0_48 = arith.constant 0 : index
      %89 = vector.load %arg20[%c0_47, %c0_48] : memref<8x8xf32, #tpu.memory_space<vmem>>, vector<8x8xf32>
      tpu.vector_store %arg20[%c0_47, %c0_48], %88 {strides = array<i32>} : memref<8x8xf32, #tpu.memory_space<vmem>>, vector<8x8xf32>,
      %90 = vector.shape_cast %88 : vector<8x8xf32> to vector<8x8x1xf32>
      %91 = vector.broadcast %90 : vector<8x8x1xf32> to vector<8x8x128xf32>
      %92 = arith.mulf %91, %53 : vector<8x8x128xf32>
      %cst_49 = arith.constant dense<0.000000e+00> : vector<8x128xf32>
      %93 = vector.multi_reduction <add>, %92, %cst_49 [1] : vector<8x8x128xf32> to vector<8x128xf32>
      %c0_50 = arith.constant 0 : index
      %c0_51 = arith.constant 0 : index
      %94 = vector.load %arg11[%c0_50, %c0_51] : memref<128x512xbf16, #tpu.memory_space<vmem>>, vector<128x512xbf16>
      %cst_52 = arith.constant dense<0.000000e+00> : vector<8x512xf32>
      %95 = tpu.matmul %51, %94, %cst_52 {dimension_numbers = #tpu.dot_dimension_numbers<[1], [0], [0], [1], [0, 0, 1, 1], [], []>} : vector<8x128xbf16>, vector<128x512xbf16>, vector<8x512xf32> -> vector<8x512xf32>
      %96 = arith.truncf %93 : vector<8x128xf32> to vector<8x128xbf16>
      %c0_53 = arith.constant 0 : index
      %c0_54 = arith.constant 0 : index
      %97 = vector.load %arg12[%c0_53, %c0_54] : memref<128x512xbf16, #tpu.memory_space<vmem>>, vector<128x512xbf16>
      %cst_55 = arith.constant dense<0.000000e+00> : vector<8x512xf32>
      %98 = tpu.matmul %96, %97, %cst_55 {dimension_numbers = #tpu.dot_dimension_numbers<[1], [0], [0], [1], [0, 0, 1, 1], [], []>} : vector<8x128xbf16>, vector<128x512xbf16>, vector<8x512xf32> -> vector<8x512xf32>
      %99 = arith.addf %95, %98 : vector<8x512xf32>
      %100 = arith.truncf %52 : vector<8x128xf32> to vector<8x128xbf16>
      %c0_56 = arith.constant 0 : index
      %c0_57 = arith.constant 0 : index
      %101 = vector.load %arg13[%c0_56, %c0_57] : memref<128x512xbf16, #tpu.memory_space<vmem>>, vector<128x512xbf16>
      %cst_58 = arith.constant dense<0.000000e+00> : vector<8x512xf32>
      %102 = tpu.matmul %100, %101, %cst_58 {dimension_numbers = #tpu.dot_dimension_numbers<[1], [0], [0], [1], [0, 0, 1, 1], [], []>} : vector<8x128xbf16>, vector<128x512xbf16>, vector<8x512xf32> -> vector<8x512xf32>
      %103 = arith.addf %99, %102 : vector<8x512xf32>
      %c0_59 = arith.constant 0 : index
      %c0_60 = arith.constant 0 : index
      %104 = vector.load %arg14[%c0_59, %c0_60] : memref<1x512xf32, #tpu.memory_space<vmem>>, vector<1x512xf32>
      %105 = vector.broadcast %104 : vector<1x512xf32> to vector<8x512xf32>
      %106 = arith.addf %103, %105 : vector<8x512xf32>
      %107 = vector.extract_strided_slice %106 {offsets = [0, 0], sizes = [8, 128], strides = [1, 1]} : vector<8x512xf32> to vector<8x128xf32>
      %108 = arith.negf %107 : vector<8x128xf32>
      %109 = math.exp %108 : vector<8x128xf32>
      %cst_61 = arith.constant 1.000000e+00 : f32
      %110 = vector.broadcast %cst_61 : f32 to vector<8x128xf32>
      %111 = arith.addf %110, %109 : vector<8x128xf32>
      %112 = arith.divf %110, %111 : vector<8x128xf32>
      %113 = vector.extract_strided_slice %106 {offsets = [0, 128], sizes = [8, 128], strides = [1, 1]} : vector<8x512xf32> to vector<8x128xf32>
      %114 = arith.negf %113 : vector<8x128xf32>
      %115 = math.exp %114 : vector<8x128xf32>
      %cst_62 = arith.constant 1.000000e+00 : f32
      %116 = vector.broadcast %cst_62 : f32 to vector<8x128xf32>
      %117 = arith.addf %116, %115 : vector<8x128xf32>
      %118 = arith.divf %116, %117 : vector<8x128xf32>
      %119 = vector.extract_strided_slice %106 {offsets = [0, 256], sizes = [8, 128], strides = [1, 1]} : vector<8x512xf32> to vector<8x128xf32>
      %120 = math.tanh %119 : vector<8x128xf32>
      %121 = vector.extract_strided_slice %106 {offsets = [0, 384], sizes = [8, 128], strides = [1, 1]} : vector<8x512xf32> to vector<8x128xf32>
      %122 = arith.negf %121 : vector<8x128xf32>
      %123 = math.exp %122 : vector<8x128xf32>
      %cst_63 = arith.constant 1.000000e+00 : f32
      %124 = vector.broadcast %cst_63 : f32 to vector<8x128xf32>
      %125 = arith.addf %124, %123 : vector<8x128xf32>
      %126 = arith.divf %124, %125 : vector<8x128xf32>
      %c0_64 = arith.constant 0 : index
      %c0_65 = arith.constant 0 : index
      %127 = vector.load %arg3[%c0_64, %c0_65] : memref<8x128xf32, #tpu.memory_space<vmem>>, vector<8x128xf32>
      %128 = arith.mulf %118, %127 : vector<8x128xf32>
      %129 = arith.mulf %112, %120 : vector<8x128xf32>
      %130 = arith.addf %128, %129 : vector<8x128xf32>
      %131 = math.tanh %130 : vector<8x128xf32>
      %132 = arith.mulf %126, %131 : vector<8x128xf32>
      %c0_66 = arith.constant 0 : index
      %c0_67 = arith.constant 0 : index
      %133 = vector.load %arg18[%c0_66, %c0_67] : memref<8x128xf32, #tpu.memory_space<vmem>>, vector<8x128xf32>
      tpu.vector_store %arg18[%c0_66, %c0_67], %132 {strides = array<i32>} : memref<8x128xf32, #tpu.memory_space<vmem>>, vector<8x128xf32>,
      %c0_68 = arith.constant 0 : index
      %c0_69 = arith.constant 0 : index
      %134 = vector.load %arg19[%c0_68, %c0_69] : memref<8x128xf32, #tpu.memory_space<vmem>>, vector<8x128xf32>
      tpu.vector_store %arg19[%c0_68, %c0_69], %130 {strides = array<i32>} : memref<8x128xf32, #tpu.memory_space<vmem>>, vector<8x128xf32>,
      %135 = arith.truncf %132 : vector<8x128xf32> to vector<8x128xbf16>
      %136 = arith.truncf %93 : vector<8x128xf32> to vector<8x128xbf16>
      %137 = tpu.concatenate %135, %136, %51 in 1 : vector<8x128xbf16>, vector<8x128xbf16>, vector<8x128xbf16> -> vector<8x384xbf16>
      %c0_70 = arith.constant 0 : index
      %c0_71 = arith.constant 0 : index
      %138 = vector.load %arg21[%c0_70, %c0_71] : memref<8x384xbf16, #tpu.memory_space<vmem>>, vector<8x384xbf16>
      tpu.vector_store %arg21[%c0_70, %c0_71], %137 {strides = array<i32>} : memref<8x384xbf16, #tpu.memory_space<vmem>>, vector<8x384xbf16>,
    } else {
    }
    %c0 = arith.constant 0 : index
    %c0_1 = arith.constant 0 : index
    %3 = vector.load %arg21[%c0, %c0_1] : memref<8x384xbf16, #tpu.memory_space<vmem>>, vector<8x384xbf16>
    %c0_2 = arith.constant 0 : index
    %c0_3 = arith.constant 0 : index
    %4 = vector.load %arg15[%c0_2, %c0_3] : memref<384x256xbf16, #tpu.memory_space<vmem>>, vector<384x256xbf16>
    %cst = arith.constant dense<0.000000e+00> : vector<8x256xf32>
    %5 = tpu.matmul %3, %4, %cst {dimension_numbers = #tpu.dot_dimension_numbers<[1], [0], [0], [1], [0, 0, 1, 1], [], []>} : vector<8x384xbf16>, vector<384x256xbf16>, vector<8x256xf32> -> vector<8x256xf32>
    %c0_4 = arith.constant 0 : index
    %c0_5 = arith.constant 0 : index
    %6 = vector.load %arg16[%c0_4, %c0_5] : memref<1x256xf32, #tpu.memory_space<vmem>>, vector<1x256xf32>
    %7 = vector.broadcast %6 : vector<1x256xf32> to vector<8x256xf32>
    %8 = arith.addf %5, %7 : vector<8x256xf32>
    %c0_6 = arith.constant 0 : index
    %c0_7 = arith.constant 0 : index
    %9 = vector.load %arg17[%c0_6, %c0_7] : memref<8x256xf32, #tpu.memory_space<vmem>>, vector<8x256xf32>
    tpu.vector_store %arg17[%c0_6, %c0_7], %8 {strides = array<i32>} : memref<8x256xf32, #tpu.memory_space<vmem>>, vector<8x256xf32>,
    return
  }
  func.func @transform_0(%arg0: i32, %arg1: memref<8xi32, #tpu.memory_space<smem>>) -> (i32, i32) {
    %c0_i32 = arith.constant 0 : i32
    %c0_i32_0 = arith.constant 0 : i32
    %c0_i32_1 = arith.constant 0 : i32
    return %c0_i32, %c0_i32_0 : i32, i32
  }
  func.func @transform_1(%arg0: i32, %arg1: memref<8xi32, #tpu.memory_space<smem>>) -> (i32, i32) {
    %c0_i32 = arith.constant 0 : i32
    %c0_i32_0 = arith.constant 0 : i32
    %c0_i32_1 = arith.constant 0 : i32
    return %c0_i32, %c0_i32_0 : i32, i32
  }
  func.func @transform_2(%arg0: i32, %arg1: memref<8xi32, #tpu.memory_space<smem>>) -> (i32, i32, i32) {
    %c0_i32 = arith.constant 0 : i32
    %c0_i32_0 = arith.constant 0 : i32
    %c0_i32_1 = arith.constant 0 : i32
    %c0_i32_2 = arith.constant 0 : i32
    return %c0_i32, %c0_i32_0, %c0_i32_1 : i32, i32, i32
  }
  func.func @transform_3(%arg0: i32, %arg1: memref<8xi32, #tpu.memory_space<smem>>) -> (i32, i32) {
    %c0_i32 = arith.constant 0 : i32
    %c0_i32_0 = arith.constant 0 : i32
    %c0_i32_1 = arith.constant 0 : i32
    return %c0_i32, %c0_i32_0 : i32, i32
  }
  func.func @transform_4(%arg0: i32, %arg1: memref<8xi32, #tpu.memory_space<smem>>) -> (i32, i32, i32) {
    %c0_i32 = arith.constant 0 : i32
    %c0_i32_0 = arith.constant 0 : i32
    %c0_i32_1 = arith.constant 0 : i32
    %c0_i32_2 = arith.constant 0 : i32
    return %c0_i32, %c0_i32_0, %c0_i32_1 : i32, i32, i32
  }
  func.func @transform_5(%arg0: i32, %arg1: memref<8xi32, #tpu.memory_space<smem>>) -> (i32, i32) {
    %c0_i32 = arith.constant 0 : i32
    %c0_i32_0 = arith.constant 0 : i32
    %c0_i32_1 = arith.constant 0 : i32
    return %c0_i32, %c0_i32_0 : i32, i32
  }
  func.func @transform_6(%arg0: i32, %arg1: memref<8xi32, #tpu.memory_space<smem>>) -> (i32, i32) {
    %c0_i32 = arith.constant 0 : i32
    %c0_i32_0 = arith.constant 0 : i32
    %c0_i32_1 = arith.constant 0 : i32
    return %c0_i32, %c0_i32_0 : i32, i32
  }
  func.func @transform_7(%arg0: i32, %arg1: memref<8xi32, #tpu.memory_space<smem>>) -> (i32, i32) {
    %c0_i32 = arith.constant 0 : i32
    %c0_i32_0 = arith.constant 0 : i32
    %c0_i32_1 = arith.constant 0 : i32
    return %c0_i32, %c0_i32_0 : i32, i32
  }
  func.func @transform_8(%arg0: i32, %arg1: memref<8xi32, #tpu.memory_space<smem>>) -> (i32, i32) {
    %c0_i32 = arith.constant 0 : i32
    %c0_i32_0 = arith.constant 0 : i32
    %c0_i32_1 = arith.constant 0 : i32
    return %c0_i32, %c0_i32_0 : i32, i32
  }
  func.func @transform_9(%arg0: i32, %arg1: memref<8xi32, #tpu.memory_space<smem>>) -> (i32, i32) {
    %c0_i32 = arith.constant 0 : i32
    %c0_i32_0 = arith.constant 0 : i32
    %c0_i32_1 = arith.constant 0 : i32
    return %c0_i32, %c0_i32_0 : i32, i32
  }
  func.func @transform_10(%arg0: i32, %arg1: memref<8xi32, #tpu.memory_space<smem>>) -> (i32, i32) {
    %c0_i32 = arith.constant 0 : i32
    %c0_i32_0 = arith.constant 0 : i32
    %c0_i32_1 = arith.constant 0 : i32
    return %c0_i32, %c0_i32_0 : i32, i32
  }
  func.func @transform_11(%arg0: i32, %arg1: memref<8xi32, #tpu.memory_space<smem>>) -> (i32, i32) {
    %c0_i32 = arith.constant 0 : i32
    %c0_i32_0 = arith.constant 0 : i32
    %c0_i32_1 = arith.constant 0 : i32
    return %c0_i32, %c0_i32_0 : i32, i32
  }
  func.func @transform_12(%arg0: i32, %arg1: memref<8xi32, #tpu.memory_space<smem>>) -> (i32, i32) {
    %c0_i32 = arith.constant 0 : i32
    %c0_i32_0 = arith.constant 0 : i32
    %c0_i32_1 = arith.constant 0 : i32
    return %c0_i32, %c0_i32_0 : i32, i32
  }
  func.func @transform_13(%arg0: i32, %arg1: memref<8xi32, #tpu.memory_space<smem>>) -> (i32, i32) {
    %c0_i32 = arith.constant 0 : i32
    %c0_i32_0 = arith.constant 0 : i32
    return %c0_i32, %arg0 : i32, i32
  }
  func.func @transform_14(%arg0: i32, %arg1: memref<8xi32, #tpu.memory_space<smem>>) -> (i32, i32) {
    %c0_i32 = arith.constant 0 : i32
    %c0_i32_0 = arith.constant 0 : i32
    return %c0_i32, %arg0 : i32, i32
  }
  func.func @transform_15(%arg0: i32, %arg1: memref<8xi32, #tpu.memory_space<smem>>) -> (i32, i32) {
    %c0_i32 = arith.constant 0 : i32
    %c0_i32_0 = arith.constant 0 : i32
    return %c0_i32, %arg0 : i32, i32
  }
  func.func @transform_16(%arg0: i32, %arg1: memref<8xi32, #tpu.memory_space<smem>>) -> (i32, i32) {
    %c0_i32 = arith.constant 0 : i32
    %c0_i32_0 = arith.constant 0 : i32
    %c0_i32_1 = arith.constant 0 : i32
    return %c0_i32, %c0_i32_0 : i32, i32
  }
  func.func @transform_17(%arg0: i32, %arg1: memref<8xi32, #tpu.memory_space<smem>>) -> (i32, i32) {
    %c0_i32 = arith.constant 0 : i32
    %c0_i32_0 = arith.constant 0 : i32
    %c0_i32_1 = arith.constant 0 : i32
    return %c0_i32, %c0_i32_0 : i32, i32
  }
  func.func @transform_18(%arg0: i32, %arg1: memref<8xi32, #tpu.memory_space<smem>>) -> (i32, i32) {
    %c0_i32 = arith.constant 0 : i32
    %c0_i32_0 = arith.constant 0 : i32
    %c0_i32_1 = arith.constant 0 : i32
    return %c0_i32, %c0_i32_0 : i32, i32
  }
}

</mosaic_0001>

<bundles_post_ra>
// kernel: decoder_forward.1
= control target key start
LH: loop header
LB: loop body
LE: loop exit
PB: predicated region body
PF: predicated region fallthrough
CT: control target
= control target key end

     0   :  { %s3211_s21 = smov [#allocation4]   ;;  %s3955_s0 = inlined_call_operand.vmem [shape: s32[8], index: 0, kind: input, shape index: {}]   ;;  %s3956_s1 = inlined_call_operand.vmem [shape: f32[8,128], index: 1, kind: input, shape index: {}]   ;;  %s3957_s2 = inlined_call_operand.hbm [shape: f32[8,128], index: 2, kind: input, shape index: {}]   ;;  %s3958_s3 = inlined_call_operand.vmem [shape: f32[8,8,128], index: 3, kind: input, shape index: {}]   ;;  %s3959_s4 = inlined_call_operand.hbm [shape: f32[8,8], index: 4, kind: input, shape index: {}]   ;;  %s3960_s5 = inlined_call_operand.vmem [shape: bf16[256,1,128], index: 5, kind: input, shape index: {}]   ;;  %s3961_s6 = inlined_call_operand.vmem [shape: bf16[128,128], index: 6, kind: input, shape index: {}]   ;;  %s3962_s7 = inlined_call_operand.vmem [shape: bf16[128,128], index: 7, kind: input, shape index: {}]   ;;  %s3963_s8 = inlined_call_operand.hbm [shape: f32[1,128], index: 8, kind: input, shape index: {}]   ;;  %s3964_s9 = inlined_call_operand.hbm [shape: f32[1,128], index: 9, kind: input, shape index: {}]   ;;  %s3965_s10 = inlined_call_operand.hbm [shape: bf16[128,512], index: 10, kind: input, shape index: {}]   ;;  %s3966_s11 = inlined_call_operand.hbm [shape: bf16[128,512], index: 11, kind: input, shape index: {}]   ;;  %s3967_s12 = inlined_call_operand.hbm [shape: bf16[128,512], index: 12, kind: input, shape index: {}]   ;;  %s3968_s13 = inlined_call_operand.hbm [shape: f32[1,512], index: 13, kind: input, shape index: {}]   ;;  %s3969_s14 = inlined_call_operand.vmem [shape: bf16[384,256], index: 14, kind: input, shape index: {}]   ;;  %s3970_s15 = inlined_call_operand.vmem [shape: f32[1,256], index: 15, kind: input, shape index: {}]   ;;  %s3971_s16 = inlined_call_operand.hbm [shape: f32[8,256], index: 16, kind: output, shape index: {0}]   ;;  %s3972_s17 = inlined_call_operand.hbm [shape: f32[8,128], index: 17, kind: output, shape index: {1}]   ;;  %s3973_s18 = inlined_call_operand.hbm [shape: f32[8,128], index: 18, kind: output, shape index: {2}]   ;;  %s3974_s19 = inlined_call_operand.hbm [shape: f32[8,8], index: 19, kind: output, shape index: {3}]  }
   0x1   :  { %3977 = sst [smem:[#allocation34_spill]] %s3955_s0 }
   0x2   :  { %3978 = sst [smem:[#allocation35_spill]] %s3956_s1 }
   0x3   :  { %3979 = sst [smem:[#allocation36_spill]] %s3957_s2 }
   0x4   :  { %3980 = sst [smem:[#allocation37_spill]] %s3958_s3 }
   0x5   :  { %3981 = sst [smem:[#allocation38_spill]] %s3960_s5 }
   0x6   :  { %s3982_s20 = sld [smem:[#allocation34_spill]] }
   0xc   :  { %s26_s5 = sshll.u32 %s3982_s20, 4  ;;  %s27_s5 = int_to_ptr.vmem [resolvable:$true] %s26_s5 }
   0xd   :  { %29 = dma.vmem_to_smem %s27_s5, 16, %s3211_s21, [#allocation3] }
   0xe   :  { %3193 = dma.done.wait [#allocation3], 16 }
   0xf   :  { %3194 = vsyncadd [#allocation3], 4294967280 }
  0x10   :  { %32 = sfence }
  0x11   :  { %33 = vsyncpa [#allocation6], 0 }
  0x12   :  { %34 = vsyncpa [#allocation9], 0 }
  0x13   :  { %35 = vsyncpa [#allocation12], 0 }
  0x14   :  { %36 = vsyncpa [#allocation15], 0 }
  0x15   :  { %37 = vsyncpa [#allocation18], 0 }
  0x16   :  { %38 = vsyncpa [#allocation7], 0 }
  0x17   :  { %39 = vsyncpa [#allocation21], 0  ;;  %s61_s2 = sshll.u32 %s3959_s4, 4  ;;  %s62_s2 = int_to_ptr.hbm [resolvable:$true] %s61_s2 }
  0x18   :  { %40 = vsyncpa [#allocation24], 0  ;;  %s3212_s23 = smov [#allocation8]   ;;  %s89_s3 = sshll.u32 %s3964_s9, 4  ;;  %s90_s3 = int_to_ptr.hbm [resolvable:$true] %s89_s3 }
  0x19   :  { %s63_s24 = sshll.u32 %s3212_s23, 4  ;;  %s3213_s26 = smov [#allocation11]   ;;  %s64_s24 = int_to_ptr.vmem [resolvable:$true] %s63_s24 }
  0x1a   :  { %66 = dma.hbm_to_vmem [thread:$0]  %s62_s2, 128, %s64_s24, [#allocation9]  }
  0x1b   :  { %s91_s27 = sshll.u32 %s3213_s26, 4  ;;  %s112_s0 = sshll.u32 %s3966_s11, 4  ;;  %s92_s27 = int_to_ptr.vmem [resolvable:$true] %s91_s27  ;;  %s113_s0 = int_to_ptr.hbm [resolvable:$true] %s112_s0 }
  0x1c   :  { %94 = dma.hbm_to_vmem [thread:$0]  %s90_s3, 16, %s92_s27, [#allocation12]  }
  0x1d   :  { %s3214_s4 = smov [#allocation14]   ;;  %s3983_s1 = sld [smem:[#allocation36_spill]] }
  0x1e   :  { %s114_s30 = sshll.u32 %s3214_s4, 4  ;;  %s3215_s23 = smov 256   ;;  %s115_s30 = int_to_ptr.vmem [resolvable:$true] %s114_s30 }
  0x1f   :  { %s3216_s9 = smov 16   ;;  %s3217_s2 = smov [#allocation5]  }
  0x20   :  { %120 = dma.hbm_to_vmem [thread:$0]  %s113_s0, 4096, %s115_s30, [#allocation15], %s3215_s23, %s3215_s23, %s3216_s9  }
  0x21   :  { %s50_s24 = sshll.u32 %s3217_s2, 4  ;;  %s78_s11 = sshll.u32 %s3963_s8, 4  ;;  %s51_s24 = int_to_ptr.vmem [resolvable:$true] %s50_s24  ;;  %s79_s11 = int_to_ptr.hbm [resolvable:$true] %s78_s11 }
  0x22   :  { %s99_s27 = sshll.u32 %s3965_s10, 4  ;;  %s3218_s28 = smov [#allocation10]   ;;  %s100_s27 = int_to_ptr.hbm [resolvable:$true] %s99_s27 }
  0x23   :  { %s48_s22 = sshll.u32 %s3983_s1, 4  ;;  %s80_s29 = sshll.u32 %s3218_s28, 4  ;;  %s49_s22 = int_to_ptr.hbm [resolvable:$true] %s48_s22  ;;  %s81_s29 = int_to_ptr.vmem [resolvable:$true] %s80_s29 }
  0x24   :  { %53 = dma.hbm_to_vmem [thread:$0]  %s49_s22, 128, %s51_s24, [#allocation6]  }
  0x25   :  { %83 = dma.hbm_to_vmem [thread:$0]  %s79_s11, 16, %s81_s29, [#allocation9]  }
  0x26   :  { %s3219_s0 = smov [#allocation13]   ;;  %s125_s21 = sshll.u32 %s3967_s12, 4  ;;  %s126_s21 = int_to_ptr.hbm [resolvable:$true] %s125_s21 }
  0x27   :  { %s101_s4 = sshll.u32 %s3219_s0, 4  ;;  %s139_s10 = sshll.u32 %s3968_s13, 4  ;;  %s102_s4 = int_to_ptr.vmem [resolvable:$true] %s101_s4  ;;  %s140_s10 = int_to_ptr.hbm [resolvable:$true] %s139_s10 }
  0x28   :  { %107 = dma.hbm_to_vmem [thread:$0]  %s100_s27, 4096, %s102_s4, [#allocation12], %s3215_s23, %s3215_s23, %s3216_s9  }
  0x29   :  { %s3220_s22 = smov [#allocation16]   ;;  %s3221_s24 = smov [#allocation17]  }
  0x2a   :  { %s127_s2 = sshll.u32 %s3220_s22, 4  ;;  %s141_s12 = sshll.u32 %s3221_s24, 4  ;;  %s128_s2 = int_to_ptr.vmem [resolvable:$true] %s127_s2  ;;  %s142_s12 = int_to_ptr.vmem [resolvable:$true] %s141_s12 }
  0x2b   :  { %133 = dma.hbm_to_vmem [thread:$0]  %s126_s21, 4096, %s128_s2, [#allocation15], %s3215_s23, %s3215_s23, %s3216_s9  }
  0x2c   :  { %144 = dma.hbm_to_vmem [thread:$0]  %s140_s10, 64, %s142_s12, [#allocation18]  }
  0x2d   :  { %3195 = dma.done.wait [#allocation6], 128  }
  0x2e   :  { %3196 = vsyncadd [#allocation6], 4294967168 }
  0x2f   :  { %3197 = dma.done.wait [#allocation9], 144  }
  0x30   :  { %3198 = vsyncadd [#allocation9], 4294967152 }
  0x31   :  { %3199 = dma.done.wait [#allocation12], 4112  }
  0x32   :  { %3200 = vsyncadd [#allocation12], 4294963184 }
  0x33   :  { %3201 = dma.done.wait [#allocation15], 8192  }
  0x34   :  { %3202 = vsyncadd [#allocation15], 4294959104 }
  0x35   :  { %3203 = dma.done.wait [#allocation18], 64  }
  0x36   :  { %3204 = vsyncadd [#allocation18], 4294967232  ;;  %v2679_v0 = vld [vmem:[%s3961_s6 + $0x38] sm:$0xff]  ;;  %v2678_v2 = vld [vmem:[%s3961_s6 + $0x30] sm:$0xff]  ;;  %s3984_s0 = sld [smem:[#allocation35_spill]]  ;;  %vm537_vm0 = vcmask 1041409  }
  0x37   :  { %v2687_v1 = vld [vmem:[%s3962_s7 + $0x38] sm:$0xff]  ;;  %327 = vmatpush.bf16.msra.mxu0 %v2679_v0  ;;  %v2686_v3 = vld [vmem:[%s3962_s7 + $0x30] sm:$0xff]  ;;  %v2677_v4 = vld [vmem:[%s3961_s6 + $0x28] sm:$0xff]  ;;  %s3985_s20 = sld [smem:[#allocation37_spill]]  ;;  %vm539_vm1 = vcmask 1042434   ;;  %vm541_vm2 = vcmask 1043459  }
  0x38   :  { %408 = vmatpush.bf16.msra.mxu1 %v2687_v1  ;;  %v2685_v5 = vld [vmem:[%s3962_s7 + $0x28] sm:$0xff]  ;;  %v2676_v6 = vld [vmem:[%s3961_s6 + $0x20] sm:$0xff]  ;;  %v2675_v8 = vld [vmem:[%s3961_s6 + $0x18] sm:$0xff]  ;;  %vm543_vm3 = vcmask 1044484   ;;  %vm545_vm4 = vcmask 1045509   ;;  %vm547_vm5 = vcmask 1046534  }
  0x39   :  { %v2684_v7 = vld [vmem:[%s3962_s7 + $0x20] sm:$0xff]  ;;  %v2683_v9 = vld [vmem:[%s3962_s7 + $0x18] sm:$0xff]  ;;  %v2674_v10 = vld [vmem:[%s3961_s6 + $0x10] sm:$0xff]  ;;  %vm549_vm6 = vcmask 1047559   ;;  %vm553_vm8 = vcmask 64512   ;;  %s3491_s9 = sld [smem:[#allocation4 + $0x1]] }
  0x3a   :  { %v2682_v11 = vld [vmem:[%s3962_s7 + $0x10] sm:$0xff]  ;;  %v2673_v12 = vld [vmem:[%s3961_s6 + $0x8] sm:$0xff]  ;;  %v2672_v14 = vld [vmem:[%s3961_s6] sm:$0xff]  ;;  %s3493_s11 = sld [smem:[#allocation4 + $0x2]]  ;;  %vm238_vm13 = vcmask 1040384   ;;  %vm240_vm14 = vcmask 1041408  }
  0x3b   :  { %328 = vmatpush.bf16.msra.mxu0 %v2678_v2  ;;  %v2681_v13 = vld [vmem:[%s3962_s7 + $0x8] sm:$0xff]  ;;  %v2680_v15 = vld [vmem:[%s3962_s7] sm:$0xff]  ;;  %v3464_v33 = vld [vmem:[#allocation10] ss:$0 sm:$0xff]  ;;  %s3495_s3 = sld [smem:[#allocation4]]  ;;  %vm242_vm15 = vcmask 1042432  }
  0x3c   :  { %409 = vmatpush.bf16.msra.mxu1 %v2686_v3  ;;  %v253_v16 = vld [vmem:[%s3984_s0] sm:$0xff]  ;;  %v2851_v42 = vld [vmem:[#allocation11] ss:$0 sm:$0xff]  ;;  %s3497_s26 = sld [smem:[#allocation4 + $0x3]]  ;;  %s1964_s4 = sshll.u32 %s3972_s17, 4  ;;  %s1965_s4 = int_to_ptr.hbm [resolvable:$true] %s1964_s4 }
  0x3d   :  { %v3416_v17 = vld [vmem:[%s3985_s20] sm:$0xff]  ;;  %v3421_v18 = vld [vmem:[%s3985_s20 + $0x8] sm:$0xff]  ;;  %v3423_v19 = vpack.c.bf16 %v253_v16, %v253_v16  ;;  %v3431_v21 = vld [vmem:[%s3985_s20 + $0x10] sm:$0xff]  ;;  %s3499_s27 = sld [smem:[#allocation4 + $0x4]]  ;;  %s1986_s17 = sshll.u32 %s3974_s19, 4  ;;  %s1987_s17 = int_to_ptr.hbm [resolvable:$true] %s1986_s17 }
  0x3e   :  { %v340_v20 = vpack.c.bf16 %v3421_v18, %v3416_v17  ;;  %v3436_v22 = vld [vmem:[%s3985_s20 + $0x18] sm:$0xff]  ;;  %v3443_v24 = vld [vmem:[%s3985_s20 + $0x20] sm:$0xff]  ;;  %v3448_v25 = vld [vmem:[%s3985_s20 + $0x28] sm:$0xff]  ;;  %s3501_s28 = sld [smem:[#allocation4 + $0x5]] }
  0x3f   :  { %329 = vmatpush.bf16.msra.mxu0 %v2677_v4  ;;  %v341_v23 = vpack.c.bf16 %v3436_v22, %v3431_v21  ;;  %v342_v26 = vpack.c.bf16 %v3448_v25, %v3443_v24  ;;  %v260_v27 = vld [vmem:[%s3985_s20 + $0x30] sm:$0xff]  ;;  %v3458_v28 = vld [vmem:[%s3985_s20 + $0x38] sm:$0xff]  ;;  %s3503_s29 = sld [smem:[#allocation4 + $0x6]] }
  0x40   :  { %410 = vmatpush.bf16.msra.mxu1 %v2685_v5  ;;  %v343_v29 = vpack.c.bf16 %v3458_v28, %v260_v27  ;;  %s3506_s0 = sld [smem:[#allocation4 + $0x7]] }
  0x41   :  { %s3986_s21 = sld [smem:[#allocation38_spill]] }
  0x43   :  { %330 = vmatpush.bf16.msra.mxu0 %v2676_v6 }
  0x44   :  { %411 = vmatpush.bf16.msra.mxu1 %v2684_v7 }
  0x47   :  { %331 = vmatpush.bf16.msra.mxu0 %v2675_v8  ;;  %s190_s8 = scalar_lea.vmem %s3986_s21, %s3491_s9  ;;  %s194_s1 = scalar_lea.vmem %s3986_s21, %s3493_s11 }
  0x48   :  { %412 = vmatpush.bf16.msra.mxu1 %v2683_v9  ;;  %s198_s2 = scalar_lea.vmem %s3986_s21, %s3497_s26  ;;  %s186_s13 = scalar_lea.vmem %s3986_s21, %s3495_s3 }
  0x49   :  { %s202_s23 = scalar_lea.vmem %s3986_s21, %s3499_s27  ;;  %s206_s3 = scalar_lea.vmem %s3986_s21, %s3501_s28 }
  0x4a   :  { %s210_s30 = scalar_lea.vmem %s3986_s21, %s3503_s29  ;;  %s214_s7 = scalar_lea.vmem %s3986_s21, %s3506_s0 }
  0x4b   :  { %332 = vmatpush.bf16.msra.mxu0 %v2674_v10  ;;  %s1975_s27 = sshll.u32 %s3973_s18, 4  ;;  %s3223_s28 = smov [#allocation22]   ;;  %s1976_s27 = int_to_ptr.hbm [resolvable:$true] %s1975_s27 }
  0x4c   :  { %413 = vmatpush.bf16.msra.mxu1 %v2682_v11  ;;  %s3224_s29 = smov [#allocation23]   ;;  %s3225_s18 = smov [#allocation19]  }
  0x4d   :  { %s1984_s0 = sshll.u32 %s3224_s29, 4  ;;  %s1951_s19 = sshll.u32 %s3225_s18, 4  ;;  %s1985_s0 = int_to_ptr.vmem [resolvable:$true] %s1984_s0  ;;  %s1952_s19 = int_to_ptr.vmem [resolvable:$true] %s1951_s19 }
  0x4f   :  { %333 = vmatpush.bf16.msra.mxu0 %v2673_v12 }
  0x50   :  { %414 = vmatpush.bf16.msra.mxu1 %v2681_v13 }
  0x53   :  { %334 = vmatpush.bf16.msra.mxu0 %v2672_v14 }
  0x54   :  { %415 = vmatpush.bf16.msra.mxu1 %v2680_v15 }
  0x56   :  { %335 = vmatmul.bf16.vlgmr.msra.gmra.mxu0 %v3423_v19 }
  0x57   :  { %416 = vmatmul.bf16.vlgmr.msra.gmra.mxu1 %v340_v20 }
  0x67   :  { %421 = vmatmul.bf16.gmra.mxu1 %v341_v23 }
  0x77   :  { %426 = vmatmul.bf16.gmra.mxu1 %v342_v26 }
  0x87   :  { %431 = vmatmul.bf16.gmra.mxu1 %v343_v29 }
  0xd3   :  { %v3461_v30 = vpop.f32.mrf.mxu0 }
  0xd4   :  { %v417_v31 = vpop.f32.mrf.mxu1  ;;  %v445_v32 = vperm.slane %v3461_v30, 0  ;;  %v438_v34 = vrot.slane %v3461_v30, 1  ;;  %v439_v41 = vrot.slane %v3461_v30, 2  ;;  %v440_v49 = vrot.slane %v3461_v30, 3 }
  0xd5   :  { %v441_v56 = vrot.slane %v3461_v30, 4  ;;  %v442_v63 = vrot.slane %v3461_v30, 5  ;;  %v443_v8 = vrot.slane %v3461_v30, 6  ;;  %v444_v15 = vrot.slane %v3461_v30, 7 }
  0xd6   :  { %v461_v35 = vadd.f32 %v445_v32, %v417_v31  ;;  %v446_v37 = vperm.slane %v438_v34, 0  ;;  %v447_v45 = vperm.slane %v439_v41, 0  ;;  %v448_v52 = vperm.slane %v440_v49, 0 }
  0xd7   :  { %v449_v60 = vperm.slane %v441_v56, 0  ;;  %v450_v3 = vperm.slane %v442_v63, 0  ;;  %v451_v10 = vperm.slane %v443_v8, 0  ;;  %v452_v20 = vperm.slane %v444_v15, 0 }
  0xd8   :  { %v473_v36 = vadd.f32 %v3464_v33, %v461_v35 }
  0xda   :  { %2852 = vtanh.f32 %v473_v36 }
  0xdb   :  { %v338_v39 = vpop.f32.mrf.mxu0 }
  0xdc   :  { %v419_v38 = vpop.f32.mrf.mxu1 }
  0xdd   :  { %v462_v40 = vadd.f32 %v446_v37, %v419_v38  ;;  %v527_v38 = vlaneseq }
  0xdf   :  { %v474_v43 = vadd.f32 %v3464_v33, %v462_v40  ;;  %v528_v39 = vand.u32 127, %v527_v38 }
  0xe0   :  { %v2853_v44 = vpop.eup %2852 }
  0xe1   :  { %2854 = vtanh.f32 %v474_v43  ;;  %v493_v46 = vmul.f32 %v2853_v44, %v2851_v42 }
  0xe3   :  { %501 = vadd.xlane.f32.xlu0 %v493_v46 }
  0xe4   :  { %v422_v47 = vpop.f32.mrf.mxu1 }
  0xe5   :  { %v463_v48 = vadd.f32 %v447_v45, %v422_v47 }
  0xe7   :  { %v2855_v50 = vpop.eup %2854  ;;  %v475_v51 = vadd.f32 %v3464_v33, %v463_v48 }
  0xe8   :  { %v494_v53 = vmul.f32 %v2855_v50, %v2851_v42 }
  0xe9   :  { %2856 = vtanh.f32 %v475_v51  ;;  %v517_v51 = vld [vmem:[#allocation8] sm:$0xff] }
  0xea   :  { %vm518_vm7 = vcmp.gt.f32.partialorder %v517_v51, 0.0 }
  0xeb   :  { %503 = vadd.xlane.f32.xlu0 %v494_v53 }
  0xec   :  { %v424_v54 = vpop.f32.mrf.mxu1 }
  0xed   :  { %v464_v55 = vadd.f32 %v448_v52, %v424_v54 }
  0xef   :  { %v2857_v57 = vpop.eup %2856  ;;  %v476_v58 = vadd.f32 %v3464_v33, %v464_v55 }
  0xf0   :  { %v495_v59 = vmul.f32 %v2857_v57, %v2851_v42 }
  0xf1   :  { %2858 = vtanh.f32 %v476_v58 }
  0xf2   :  { %505 = vadd.xlane.f32.xlu1 %v495_v59 }
  0xf4   :  { %v427_v61 = vpop.f32.mrf.mxu1 }
  0xf5   :  { %v465_v62 = vadd.f32 %v449_v60, %v427_v61 }
  0xf7   :  { %v2859_v0 = vpop.eup %2858  ;;  %v477_v1 = vadd.f32 %v3464_v33, %v465_v62 }
  0xf8   :  { %v496_v2 = vmul.f32 %v2859_v0, %v2851_v42 }
  0xf9   :  { %2860 = vtanh.f32 %v477_v1 }
  0xfa   :  { %507 = vadd.xlane.f32.xlu1 %v496_v2  ;;  %v581_v2 = vshrl.u32 %v527_v38, 7  ;;  %v2748_v38 = vld [vmem:[#allocation14 + $0xe4] sm:$0xf] }
  0xfc   :  { %v429_v4 = vpop.f32.mrf.mxu1  ;;  %2849 = vset.pattern.permute.xlu0 %v581_v2  ;;  %2848 = vset.pattern.permute.xlu2 %v581_v2 }
  0xfd   :  { %v466_v5 = vadd.f32 %v450_v3, %v429_v4  ;;  %2847 = vset.pattern.permute.xlu1 %v581_v2 }
  0xff   :  { %v2861_v6 = vpop.eup %2860  ;;  %v478_v7 = vadd.f32 %v3464_v33, %v466_v5 }
 0x100   :  { %v497_v9 = vmul.f32 %v2861_v6, %v2851_v42 }
 0x101   :  { %2862 = vtanh.f32 %v478_v7 }
 0x102   :  { %509 = vadd.xlane.f32.xlu2 %v497_v9 }
 0x104   :  { %v432_v11 = vpop.f32.mrf.mxu1 }
 0x105   :  { %v467_v12 = vadd.f32 %v451_v10, %v432_v11 }
 0x107   :  { %v2863_v13 = vpop.eup %2862  ;;  %v479_v14 = vadd.f32 %v3464_v33, %v467_v12 }
 0x108   :  { %v498_v16 = vmul.f32 %v2863_v13, %v2851_v42 }
 0x109   :  { %2864 = vtanh.f32 %v479_v14 }
 0x10a   :  { %511 = vadd.xlane.f32.xlu2 %v498_v16 }
 0x10c   :  { %v434_v23 = vpop.f32.mrf.mxu1 }
 0x10d   :  { %v468_v26 = vadd.f32 %v452_v20, %v434_v23 }
 0x10f   :  { %v2865_v27 = vpop.eup %2864  ;;  %v480_v29 = vadd.f32 %v3464_v33, %v468_v26 }
 0x110   :  { %v499_v31 = vmul.f32 %v2865_v27, %v2851_v42 }
 0x111   :  { %2866 = vtanh.f32 %v480_v29 }
 0x112   :  { %513 = vadd.xlane.f32.xlu0 %v499_v31 }
 0x117   :  { %v2867_v32 = vpop.eup %2866 }
 0x118   :  { %v500_v34 = vmul.f32 %v2867_v32, %v2851_v42  ;;  %v2207_v32 = vld [vmem:[#allocation14 + $0xe0] sm:$0xf] }
 0x11a   :  { %515 = vadd.xlane.f32.xlu1 %v500_v34  ;;  %v2750_v34 = vld [vmem:[#allocation14 + $0xec] sm:$0xf0] }
 0x156   :  { %v502_v35 = vpop.xlane.xlu0 %501 }
 0x157   :  { %v529_v45 = vperm.slane %v502_v35, %v528_v39  ;;  %v2343_v35 = vld [vmem:[#allocation13 + $0xe8] sm:$0xf] }
 0x15e   :  { %v504_v30 = vpop.xlane.xlu0 %503 }
 0x15f   :  { %v530_v41 = vperm.slane %v504_v30, %v528_v39  ;;  %v2209_v30 = vld [vmem:[#allocation14 + $0xf0] sm:$0xf0] }
 0x161   :  { %v538_v42 = vsel %vm537_vm0, %v530_v41, %v529_v45  ;;  %v2215_v41 = vld [vmem:[#allocation14 + $0xe8] sm:$0xf]  ;;  %v2191_v45 = vld [vmem:[#allocation14 + $0xc0] sm:$0xf] }
 0x165   :  { %v506_v36 = vpop.xlane.xlu1 %505 }
 0x166   :  { %v531_v43 = vperm.slane %v506_v36, %v528_v39  ;;  %v2208_v36 = vor.u32 %v2750_v34, %v2207_v32  ;;  %v2151_v34 = vld [vmem:[#allocation14 + $0x68] sm:$0xf] }
 0x168   :  { %v540_v49 = vsel %vm539_vm1, %v531_v43, %v538_v42  ;;  %v2751_v43 = vld [vmem:[#allocation14 + $0xf4] sm:$0xf0]  ;;  %956 = vmatpush.bf16.msra.mxu2 %v2208_v36 }
 0x169   :  { %v2715_v42 = vld [vmem:[#allocation13 + $0xd4] sm:$0xf0] }
 0x16d   :  { %v508_v40 = vpop.xlane.xlu1 %507 }
 0x16e   :  { %v532_v33 = vperm.slane %v508_v40, %v528_v39  ;;  %v2212_v40 = vor.u32 %v2748_v38, %v2209_v30  ;;  %v2730_v38 = vld [vmem:[#allocation14 + $0x4c] sm:$0xf0]  ;;  %v2263_v30 = vld [vmem:[#allocation13 + $0x48] sm:$0xf] }
 0x170   :  { %v542_v52 = vsel %vm541_vm2, %v532_v33, %v540_v49  ;;  %969 = vmatpush.bf16.msra.mxu3 %v2212_v40  ;;  %v2746_v33 = vld [vmem:[#allocation14 + $0xcc] sm:$0xf0]  ;;  %v2193_v49 = vld [vmem:[#allocation14 + $0xd0] sm:$0xf0]  ;;  %v2699_v40 = vld [vmem:[#allocation13 + $0x54] sm:$0xf0] }
 0x175   :  { %v510_v37 = vpop.xlane.xlu2 %509 }
 0x176   :  { %v533_v47 = vperm.slane %v510_v37, %v528_v39  ;;  %v2719_v37 = vld [vmem:[#allocation13 + $0xf4] sm:$0xf0] }
 0x178   :  { %v544_v53 = vsel %vm543_vm3, %v533_v47, %v542_v52  ;;  %v2192_v47 = vor.u32 %v2746_v33, %v2191_v45  ;;  %v2199_v52 = vld [vmem:[#allocation14 + $0xc8] sm:$0xf] }
 0x179   :  { %v2135_v33 = vld [vmem:[#allocation14 + $0x48] sm:$0xf] }
 0x17a   :  { %957 = vmatpush.bf16.msra.mxu2 %v2192_v47 }
 0x17d   :  { %v512_v44 = vpop.xlane.xlu2 %511 }
 0x17e   :  { %v534_v48 = vperm.slane %v512_v44, %v528_v39  ;;  %v2216_v44 = vor.u32 %v2751_v43, %v2215_v41  ;;  %v2728_v41 = vld [vmem:[#allocation14 + $0x44] sm:$0xf]  ;;  %v2129_v43 = vld [vmem:[#allocation14 + $0x50] sm:$0xf0] }
 0x17f   :  { %v2132_v45 = vor.u32 %v2728_v41, %v2129_v43  ;;  %v2741_v43 = vld [vmem:[#allocation14 + $0xac] sm:$0xf] }
 0x180   :  { %v546_v55 = vsel %vm545_vm4, %v534_v48, %v544_v53  ;;  %982 = vmatpush.bf16.msrb.mxu0 %v2216_v44  ;;  %v2744_v48 = vld [vmem:[#allocation14 + $0xc4] sm:$0xf]  ;;  %v2747_v53 = vld [vmem:[#allocation14 + $0xd4] sm:$0xf0]  ;;  %v2264_v44 = vor.u32 %v2699_v40, %v2263_v30  ;;  %v2321_v40 = vld [vmem:[#allocation13 + $0xd0] sm:$0xf0] }
 0x181   :  { %v2196_v51 = vor.u32 %v2744_v48, %v2193_v49  ;;  %v2726_v48 = vld [vmem:[#allocation14 + $0x2c] sm:$0xf0]  ;;  %v2247_v49 = vld [vmem:[#allocation13 + $0x28] sm:$0xf] }
 0x183   :  { %970 = vmatpush.bf16.msra.mxu3 %v2196_v51  ;;  %v2695_v51 = vld [vmem:[#allocation13 + $0x34] sm:$0xf0] }
 0x185   :  { %v514_v46 = vpop.xlane.xlu0 %513 }
 0x186   :  { %v535_v50 = vperm.slane %v514_v46, %v528_v39  ;;  %v2327_v46 = vld [vmem:[#allocation13 + $0xc8] sm:$0xf] }
 0x188   :  { %v548_v57 = vsel %vm547_vm5, %v535_v50, %v546_v55  ;;  %v2328_v50 = vor.u32 %v2715_v42, %v2327_v46  ;;  %v2175_v55 = vld [vmem:[#allocation14 + $0xa0] sm:$0xf]  ;;  %v2731_v46 = vld [vmem:[#allocation14 + $0x54] sm:$0xf0] }
 0x189   :  { %v2136_v47 = vor.u32 %v2731_v46, %v2135_v33  ;;  %v2111_v42 = vld [vmem:[#allocation14 + $0x20] sm:$0xf] }
 0x18d   :  { %v516_v54 = vpop.xlane.xlu1 %515 }
 0x18e   :  { %v536_v56 = vperm.slane %v516_v54, %v528_v39  ;;  %v2344_v39 = vor.u32 %v2719_v37, %v2343_v35  ;;  %v2200_v54 = vor.u32 %v2747_v53, %v2199_v52  ;;  %v2735_v35 = vld [vmem:[#allocation14 + $0x74] sm:$0xf0]  ;;  %v2127_v37 = vld [vmem:[#allocation14 + $0x40] sm:$0xf]  ;;  %v2724_v52 = vld [vmem:[#allocation14 + $0x24] sm:$0xf] }
 0x18f   :  { %v2152_v36 = vor.u32 %v2735_v35, %v2151_v34  ;;  %v2113_v53 = vld [vmem:[#allocation14 + $0x30] sm:$0xf0] }
 0x190   :  { %v550_v58 = vsel %vm549_vm6, %v536_v56, %v548_v57  ;;  %1194 = vmatpush.bf16.msrb.mxu1 %v2344_v39  ;;  %v2742_v56 = vld [vmem:[#allocation14 + $0xac] sm:$0xf0]  ;;  %v2311_v57 = vld [vmem:[#allocation13 + $0xa8] sm:$0xf]  ;;  %983 = vmatpush.bf16.msrb.mxu0 %v2200_v54  ;;  %v2128_v39 = vor.u32 %v2730_v38, %v2127_v37  ;;  %v2248_v54 = vor.u32 %v2695_v51, %v2247_v49  ;;  %v2319_v37 = vld [vmem:[#allocation13 + $0xc0] sm:$0xf] }
 0x191   :  { %v552_v59 = vsel %vm518_vm7, %v550_v58, -1e+10  ;;  %v2176_v58 = vor.u32 %v2742_v56, %v2175_v55  ;;  %v2116_v55 = vor.u32 %v2724_v52, %v2113_v53  ;;  %v2119_v56 = vld [vmem:[#allocation14 + $0x28] sm:$0xf]  ;;  %v2714_v38 = vld [vmem:[#allocation13 + $0xcc] sm:$0xf0] }
 0x192   :  { %v554_v60 = vsel %vm553_vm8, %v552_v59, -inf  ;;  %v2710_v49 = vld [vmem:[#allocation13 + $0xac] sm:$0xf0]  ;;  %v2305_v51 = vld [vmem:[#allocation13 + $0xb0] sm:$0xf0]  ;;  %vm244_vm7 = vcmask 1043456  }
 0x193   :  { %555 = vmax.xlane.f32.xlu2 %v554_v60  ;;  %v2740_v60 = vld [vmem:[#allocation14 + $0xa4] sm:$0xf]  ;;  %958 = vmatpush.bf16.msra.mxu2 %v2176_v58 }
 0x194   :  { %1195 = vmatpush.bf16.msrb.mxu1 %v2328_v50  ;;  %v2112_v50 = vor.u32 %v2726_v48, %v2111_v42  ;;  %v2303_v42 = vld [vmem:[#allocation13 + $0xa0] sm:$0xf] }
 0x195   :  { %v2304_v52 = vor.u32 %v2710_v49, %v2303_v42  ;;  %v2271_v42 = vld [vmem:[#allocation13 + $0x60] sm:$0xf] }
 0x206   :  { %v556_v61 = vpop.xlane.xlu2 %555 }
 0x207   :  { %v557_v62 = vsub.f32 %v552_v59, %v556_v61  ;;  %v2711_v59 = vld [vmem:[#allocation13 + $0xb4] sm:$0xf0]  ;;  %v2177_v61 = vld [vmem:[#allocation14 + $0xb0] sm:$0xf0] }
 0x209   :  { %v558_v63 = vmul.f32 1.442695, %v557_v62  ;;  %v2312_v62 = vor.u32 %v2711_v59, %v2311_v57  ;;  %v2727_v57 = vld [vmem:[#allocation14 + $0x34] sm:$0xf0] }
 0x20a   :  { %v2120_v59 = vor.u32 %v2727_v57, %v2119_v56  ;;  %v199_v56 = vld [vmem:[%s198_s2] sm:$0x1]  ;;  %v2737_v57 = vld [vmem:[#allocation14 + $0x8c] sm:$0xf] }
 0x20b   :  { %2868 = vpow2.f32 %v558_v63  ;;  %v2180_v63 = vor.u32 %v2740_v60, %v2177_v61  ;;  %1196 = vmatpush.bf16.msrb.mxu1 %v2312_v62  ;;  %v2095_v60 = vld [vmem:[#allocation14] sm:$0xf]  ;;  %v2722_v61 = vld [vmem:[#allocation14 + $0xc] sm:$0xf0]  ;;  %v2231_v62 = vld [vmem:[#allocation13 + $0x8] sm:$0xf] }
 0x20d   :  { %971 = vmatpush.bf16.msra.mxu3 %v2180_v63  ;;  %v2096_v63 = vor.u32 %v2722_v61, %v2095_v60 }
 0x211   :  { %v2869_v0 = vpop.eup %2868 }
 0x212   :  { %v560_v1 = vsel %vm553_vm8, %v2869_v0, 0.0 }
 0x213   :  { %561 = vadd.xlane.f32.xlu0 %v560_v1  ;;  %v2743_v1 = vld [vmem:[#allocation14 + $0xb4] sm:$0xf0] }
 0x286   :  { %v562_v3 = vpop.xlane.xlu0 %561 }
 0x287   :  { %2870 = vrcp.f32 %v562_v3  ;;  %v574_v7 = vand.u32 2147483648, %v562_v3  ;;  %v572_v9 = vand.u32 2147483647, %v562_v3  ;;  %vm568_vm10 = vweird.f32 %v562_v3 }
 0x289   :  { %v575_v11 = vor.u32 1.1754944e-38, %v574_v7  ;;  %vm573_vm12 = vcmp.eq.f32.partialorder %v572_v9, 8.507059e+37  ;;  %v2707_v7 = vld [vmem:[#allocation13 + $0x94] sm:$0xf0]  ;;  %v2161_v9 = vld [vmem:[#allocation14 + $0x90] sm:$0xf0] }
 0x28d   :  { %v2871_v4 = vpop.eup %2870 }
 0x28e   :  { %v564_v5 = vmul.f32 %v2871_v4, %v562_v3  ;;  %vm569_vm9 = vweird.f32 %v2871_v4  ;;  %v2159_v3 = vld [vmem:[#allocation14 + $0x80] sm:$0xf] }
 0x28f   :  { %vm570_vm11 = vmor %vm568_vm10, %vm569_vm9  ;;  %vm248_vm9 = vcmask 1045504   ;;  %vm250_vm10 = vcmask 1046528  }
 0x290   :  { %v565_v6 = vsub.f32 1.0, %v564_v5  ;;  %v2295_v5 = vld [vmem:[#allocation13 + $0x88] sm:$0xf] }
 0x292   :  { %v566_v8 = vmul.f32 %v2871_v4, %v565_v6 }
 0x294   :  { %v567_v10 = vadd.f32 %v2871_v4, %v566_v8  ;;  %v2736_v8 = vld [vmem:[#allocation14 + $0x84] sm:$0xf] }
 0x296   :  { %v571_v12 = vsel %vm570_vm11, %v2871_v4, %v567_v10  ;;  %v2738_v4 = vld [vmem:[#allocation14 + $0x8c] sm:$0xf0]  ;;  %v2296_v10 = vor.u32 %v2707_v7, %v2295_v5  ;;  %v2103_v5 = vld [vmem:[#allocation14 + $0x8] sm:$0xf] }
 0x297   :  { %v576_v13 = vsel %vm573_vm12, %v575_v11, %v571_v12  ;;  %v2160_v6 = vor.u32 %v2738_v4, %v2159_v3  ;;  %v2164_v11 = vor.u32 %v2736_v8, %v2161_v9  ;;  %v2167_v12 = vld [vmem:[#allocation14 + $0x88] sm:$0xf]  ;;  %v2749_v8 = vld [vmem:[#allocation14 + $0xec] sm:$0xf]  ;;  %v2217_v9 = vld [vmem:[#allocation14 + $0xf8] sm:$0xf0] }
 0x298   :  { %v577_v14 = vmul.f32 %v2869_v0, %v576_v13  ;;  %v2183_v0 = vld [vmem:[#allocation14 + $0xa8] sm:$0xf]  ;;  %v2739_v13 = vld [vmem:[#allocation14 + $0x94] sm:$0xf0]  ;;  %1197 = vmatpush.bf16.msrb.mxu1 %v2296_v10 }
 0x299   :  { %v2184_v2 = vor.u32 %v2743_v1, %v2183_v0  ;;  %959 = vmatpush.bf16.msra.mxu2 %v2160_v6  ;;  %972 = vmatpush.bf16.msra.mxu3 %v2164_v11  ;;  %v2691_v0 = vld [vmem:[#allocation13 + $0x14] sm:$0xf0]  ;;  %v2720_v1 = vld [vmem:[#allocation14 + $0x4] sm:$0xf]  ;;  %v2471_v10 = vld [vmem:[#allocation16 + $0xe8] sm:$0xf]  ;;  %v2220_v11 = vor.u32 %v2749_v8, %v2217_v9  ;;  %v200_v8 = vunpack.c.l.bf16 %v199_v56 }
 0x29a   :  { %578 = vst.msk [vmem:[#allocation23] sm:$0xff] %vm553_vm8, %v577_v14  ;;  %v593_v15 = vperm.slane %v577_v14, 2  ;;  %v586_v16 = vperm.slane %v577_v14, 1  ;;  %v579_v20 = vperm.slane %v577_v14, 0  ;;  %v600_v23 = vperm.slane %v577_v14, 3 }
 0x29b   :  { %v607_v26 = vperm.slane %v577_v14, 4  ;;  %v614_v27 = vperm.slane %v577_v14, 5  ;;  %v621_v29 = vperm.slane %v577_v14, 6  ;;  %v628_v31 = vperm.slane %v577_v14, 7  ;;  %984 = vmatpush.bf16.msrb.mxu0 %v2184_v2  ;;  %v2097_v2 = vld [vmem:[#allocation14 + $0x10] sm:$0xf0] }
 0x29c   :  { %598 = vperm.xlu0 %2849, %v593_v15   ;;  %591 = vperm.xlu2 %2848, %v586_v16   ;;  %v2168_v14 = vor.u32 %v2739_v13, %v2167_v12  ;;  %v2143_v15 = vld [vmem:[#allocation14 + $0x60] sm:$0xf]  ;;  %v2734_v16 = vld [vmem:[#allocation14 + $0x6c] sm:$0xf0]  ;;  %v2232_v3 = vor.u32 %v2691_v0, %v2231_v62  ;;  %v2100_v4 = vor.u32 %v2720_v1, %v2097_v2  ;;  %v2723_v6 = vld [vmem:[#allocation14 + $0x14] sm:$0xf0] }
 0x29d   :  { %584 = vperm.xlu1 %2847, %v579_v20   ;;  %v2279_v20 = vld [vmem:[#allocation13 + $0x68] sm:$0xf]  ;;  %v2104_v7 = vor.u32 %v2723_v6, %v2103_v5  ;;  %v2783_v12 = vld [vmem:[#allocation16 + $0xf4] sm:$0xf0]  ;;  %v2335_v13 = vld [vmem:[#allocation13 + $0xe0] sm:$0xf] }
 0x29e   :  { %v2287_v0 = vld [vmem:[#allocation13 + $0x80] sm:$0xf]  ;;  %v2704_v5 = vld [vmem:[#allocation13 + $0x84] sm:$0xf]  ;;  %v2289_v6 = vld [vmem:[#allocation13 + $0x90] sm:$0xf0] }
 0x29f   :  { %985 = vmatpush.bf16.msrb.mxu0 %v2168_v14  ;;  %v2718_v14 = vld [vmem:[#allocation13 + $0xec] sm:$0xf0]  ;;  %v187_v1 = vld [vmem:[%s186_s13] sm:$0x1]  ;;  %vm246_vm8 = vcmask 1044480  }
 0x2a0   :  { %1989 = dma.vmem_to_hbm [thread:$0]  %s1985_s0, 128, %s1987_s17, [#allocation24]  }
 0x2a3   :  { %986 = vmatpush.bf16.msrb.mxu0 %v2152_v36  ;;  %v2779_v36 = vld [vmem:[#allocation16 + $0xd4] sm:$0xf0] }
 0x2a4   :  { %605 = vperm.xlu2 %2848, %v600_v23   ;;  %v2144_v23 = vor.u32 %v2734_v16, %v2143_v15  ;;  %v2472_v15 = vor.u32 %v2783_v12, %v2471_v10  ;;  %v2336_v16 = vor.u32 %v2718_v14, %v2335_v13  ;;  %v203_v12 = vld [vmem:[%s202_s23] sm:$0x1]  ;;  %v2292_v14 = vor.u32 %v2704_v5, %v2289_v6 }
 0x2a5   :  { %612 = vperm.xlu1 %2847, %v607_v26   ;;  %v2703_v26 = vld [vmem:[#allocation13 + $0x74] sm:$0xf0]  ;;  %v207_v13 = vld [vmem:[%s206_s3] sm:$0x1] }
 0x2a6   :  { %960 = vmatpush.bf16.msra.mxu2 %v2144_v23  ;;  %v2337_v23 = vld [vmem:[#allocation13 + $0xf0] sm:$0xf0] }
 0x2a7   :  { %987 = vmatpush.bf16.msrb.mxu0 %v2136_v47  ;;  %v2775_v47 = vld [vmem:[#allocation16 + $0xb4] sm:$0xf0] }
 0x2aa   :  { %961 = vmatpush.bf16.msra.mxu2 %v2128_v39  ;;  %v2320_v39 = vor.u32 %v2714_v38, %v2319_v37 }
 0x2ab   :  { %988 = vmatpush.bf16.msrb.mxu0 %v2120_v59  ;;  %v2423_v59 = vld [vmem:[#allocation16 + $0x88] sm:$0xf] }
 0x2ac   :  { %619 = vperm.xlu2 %2848, %v614_v27   ;;  %v2732_v27 = vld [vmem:[#allocation14 + $0x64] sm:$0xf] }
 0x2ad   :  { %626 = vperm.xlu1 %2847, %v621_v29   ;;  %v2145_v29 = vld [vmem:[#allocation14 + $0x70] sm:$0xf0] }
 0x2ae   :  { %v2148_v32 = vor.u32 %v2732_v27, %v2145_v29  ;;  %962 = vmatpush.bf16.msra.mxu2 %v2112_v50  ;;  %v2708_v50 = vld [vmem:[#allocation13 + $0xa4] sm:$0xf] }
 0x2af   :  { %989 = vmatpush.bf16.msrb.mxu0 %v2104_v7  ;;  %v2308_v53 = vor.u32 %v2708_v50, %v2305_v51 }
 0x2b0   :  { %973 = vmatpush.bf16.msra.mxu3 %v2148_v32  ;;  %v2455_v32 = vld [vmem:[#allocation16 + $0xc8] sm:$0xf] }
 0x2b1   :  { %v2456_v30 = vor.u32 %v2779_v36, %v2455_v32  ;;  %v224_v32 = vperm.slane %v200_v8, 0  ;;  %v2733_v36 = vld [vmem:[#allocation14 + $0x6c] sm:$0xf]  ;;  %v2257_v8 = vld [vmem:[#allocation13 + $0x50] sm:$0xf0] }
 0x2b2   :  { %963 = vmatpush.bf16.msra.mxu2 %v2096_v63  ;;  %v2771_v63 = vld [vmem:[#allocation16 + $0x94] sm:$0xf0] }
 0x2b4   :  { %633 = vperm.xlu2 %2848, %v628_v31   ;;  %v2280_v31 = vor.u32 %v2703_v26, %v2279_v20  ;;  %974 = vmatpush.bf16.msra.mxu3 %v2132_v45  ;;  %v2716_v20 = vld [vmem:[#allocation13 + $0xe4] sm:$0xf]  ;;  %v2745_v26 = vld [vmem:[#allocation14 + $0xcc] sm:$0xf]  ;;  %v2439_v45 = vld [vmem:[#allocation16 + $0xa8] sm:$0xf] }
 0x2b5   :  { %v2340_v29 = vor.u32 %v2716_v20, %v2337_v23  ;;  %v2440_v48 = vor.u32 %v2775_v47, %v2439_v45  ;;  %v211_v20 = vld [vmem:[%s210_s30] sm:$0x1]  ;;  %s3222_s30 = smov [#allocation20]  }
 0x2b6   :  { %1198 = vmatpush.bf16.msrb.mxu1 %v2280_v31  ;;  %995 = vmatpush.bf16.msrb.mxu2 %v2220_v11  ;;  %v2201_v31 = vld [vmem:[#allocation14 + $0xd8] sm:$0xf0]  ;;  %v215_v23 = vld [vmem:[%s214_s7] sm:$0x1] }
 0x2b7   :  { %v2204_v35 = vor.u32 %v2745_v26, %v2201_v31  ;;  %1181 = vmatpush.bf16.msra.mxu0 %v2340_v29  ;;  %v208_v29 = vunpack.c.l.bf16 %v207_v13  ;;  %v216_v31 = vunpack.c.l.bf16 %v215_v23  ;;  %v2725_v13 = vld [vmem:[#allocation14 + $0x2c] sm:$0xf] }
 0x2b8   :  { %975 = vmatpush.bf16.msra.mxu3 %v2116_v55  ;;  %v195_v55 = vld [vmem:[%s194_s1] sm:$0x1] }
 0x2b9   :  { %v196_v7 = vunpack.c.l.bf16 %v195_v55 }
 0x2ba   :  { %1199 = vmatpush.bf16.msrb.mxu1 %v2264_v44  ;;  %v2185_v44 = vld [vmem:[#allocation14 + $0xb8] sm:$0xf0]  ;;  %996 = vmatpush.bf16.msrb.mxu2 %v2204_v35 }
 0x2bb   :  { %v2188_v46 = vor.u32 %v2741_v43, %v2185_v44 }
 0x2bc   :  { %976 = vmatpush.bf16.msra.mxu3 %v2100_v4  ;;  %v2706_v4 = vld [vmem:[#allocation13 + $0x8c] sm:$0xf0] }
 0x2bd   :  { %v2288_v11 = vor.u32 %v2706_v4, %v2287_v0 }
 0x2be   :  { %1200 = vmatpush.bf16.msrb.mxu1 %v2248_v54  ;;  %v191_v54 = vld [vmem:[%s190_s8] sm:$0x1]  ;;  %997 = vmatpush.bf16.msrb.mxu2 %v2188_v46  ;;  %v236_v46 = vperm.slane %v216_v31, 0  ;;  %s1962_s8 = sshll.u32 %s3222_s30, 4  ;;  %s1963_s8 = int_to_ptr.vmem [resolvable:$true] %s1962_s8 }
 0x2bf   :  { %v192_v60 = vunpack.c.l.bf16 %v191_v54 }
 0x2c0   :  { %1168 = vmatpush.bf16.msrb.mxu3 %v2336_v16  ;;  %v204_v16 = vunpack.c.l.bf16 %v203_v12 }
 0x2c1   :  { %v218_v26 = vperm.slane %v192_v60, 0 }
 0x2c2   :  { %1201 = vmatpush.bf16.msrb.mxu1 %v2232_v3  ;;  %v2424_v3 = vor.u32 %v2771_v63, %v2423_v59  ;;  %v227_v37 = vperm.slane %v204_v16, 0  ;;  %v2137_v59 = vld [vmem:[#allocation14 + $0x58] sm:$0xf0] }
 0x2c4   :  { %1169 = vmatpush.bf16.msrb.mxu3 %v2320_v39  ;;  %v230_v39 = vperm.slane %v208_v29, 0 }
 0x2c6   :  { %1438 = vmatpush.bf16.msra.mxu1 %v2472_v15  ;;  %v188_v15 = vunpack.c.l.bf16 %v187_v1 }
 0x2c8   :  { %1170 = vmatpush.bf16.msrb.mxu3 %v2304_v52  ;;  %v239_v38 = vsel %vm238_vm13, %v188_v15, %v218_v26  ;;  %v2700_v52 = vld [vmem:[#allocation13 + $0x64] sm:$0xf]  ;;  %v2375_v26 = vld [vmem:[#allocation16 + $0x28] sm:$0xf] }
 0x2ca   :  { %1439 = vmatpush.bf16.msra.mxu1 %v2456_v30  ;;  %v2153_v30 = vld [vmem:[#allocation14 + $0x78] sm:$0xf0] }
 0x2cb   :  { %v2156_v56 = vor.u32 %v2733_v36, %v2153_v30 }
 0x2cc   :  { %1171 = vmatpush.bf16.msrb.mxu3 %v2288_v11 }
 0x2ce   :  { %1440 = vmatpush.bf16.msra.mxu1 %v2440_v48  ;;  %v2702_v48 = vld [vmem:[#allocation13 + $0x6c] sm:$0xf0] }
 0x2cf   :  { %v2272_v0 = vor.u32 %v2702_v48, %v2271_v42 }
 0x2d1   :  { %1172 = vmatpush.bf16.msrb.mxu3 %v2272_v0 }
 0x2d2   :  { %1441 = vmatpush.bf16.msra.mxu1 %v2424_v3 }
 0x2f6   :  { %v592_v58 = vpop.permute.xlu2 %591 }
 0x2f7   :  { %v636_v27 = vmul.f32 %v592_v58, %v3421_v18  ;;  %v2712_v18 = vld [vmem:[#allocation13 + $0xc4] sm:$0xf]  ;;  %v2169_v58 = vld [vmem:[#allocation14 + $0x98] sm:$0xf0] }
 0x2f8   :  { %v2324_v41 = vor.u32 %v2712_v18, %v2321_v40  ;;  %v2172_v62 = vor.u32 %v2737_v57, %v2169_v58  ;;  %v2407_v40 = vld [vmem:[#allocation16 + $0x68] sm:$0xf]  ;;  %v2729_v58 = vld [vmem:[#allocation14 + $0x4c] sm:$0xf] }
 0x2f9   :  { %v649_v33 = vrot.slane %v636_v27, 4  ;;  %v2140_v12 = vor.u32 %v2729_v58, %v2137_v59 }
 0x2fa   :  { %1182 = vmatpush.bf16.msra.mxu0 %v2324_v41  ;;  %998 = vmatpush.bf16.msrb.mxu2 %v2172_v62  ;;  %v2767_v41 = vld [vmem:[#allocation16 + $0x74] sm:$0xf0]  ;;  %v2391_v62 = vld [vmem:[#allocation16 + $0x48] sm:$0xf] }
 0x2fb   :  { %v650_v61 = vadd.f32 %v649_v33, %v636_v27  ;;  %v2408_v57 = vor.u32 %v2767_v41, %v2407_v40 }
 0x2fd   :  { %v651_v27 = vrot.slane %v650_v61, 2  ;;  %1442 = vmatpush.bf16.msra.mxu1 %v2408_v57 }
 0x2fe   :  { %v606_v34 = vpop.permute.xlu2 %605  ;;  %1183 = vmatpush.bf16.msra.mxu0 %v2308_v53  ;;  %v2273_v53 = vld [vmem:[#allocation13 + $0x70] sm:$0xf0]  ;;  %999 = vmatpush.bf16.msrb.mxu2 %v2156_v56 }
 0x2ff   :  { %v638_v9 = vmul.f32 %v606_v34, %v3436_v22  ;;  %v212_v22 = vunpack.c.l.bf16 %v211_v20  ;;  %v652_v43 = vadd.f32 %v651_v27, %v650_v61  ;;  %v2276_v1 = vor.u32 %v2700_v52, %v2273_v53  ;;  %v2759_v27 = vld [vmem:[#allocation16 + $0x34] sm:$0xf0] }
 0x300   :  { %v2376_v53 = vor.u32 %v2759_v27, %v2375_v26 }
 0x301   :  { %v661_v34 = vrot.slane %v638_v9, 4  ;;  %v233_v33 = vperm.slane %v212_v22, 0  ;;  %v653_v3 = vrot.slane %v652_v43, 1 }
 0x302   :  { %1184 = vmatpush.bf16.msra.mxu0 %v2292_v14  ;;  %v2121_v14 = vld [vmem:[#allocation14 + $0x38] sm:$0xf0]  ;;  %1000 = vmatpush.bf16.msrb.mxu2 %v2140_v12 }
 0x303   :  { %v662_v60 = vadd.f32 %v661_v34, %v638_v9  ;;  %v2694_v34 = vld [vmem:[#allocation13 + $0x2c] sm:$0xf0]  ;;  %v3555_v36 = vadd.f32 %v653_v3, %v652_v43  ;;  %v2755_v43 = vld [vmem:[#allocation16 + $0x14] sm:$0xf0] }
 0x305   :  { %v663_v15 = vrot.slane %v662_v60, 2 }
 0x306   :  { %v620_v2 = vpop.permute.xlu2 %619  ;;  %1185 = vmatpush.bf16.msra.mxu0 %v2276_v1 }
 0x307   :  { %v3542_v10 = vmul.f32 %v620_v2, %v3448_v25  ;;  %v221_v25 = vperm.slane %v196_v7, 0  ;;  %v2255_v2 = vld [vmem:[#allocation13 + $0x40] sm:$0xf]  ;;  %v2696_v7 = vld [vmem:[#allocation13 + $0x44] sm:$0xf] }
 0x309   :  { %v673_v35 = vrot.slane %v3542_v10, 4  ;;  %v241_v18 = vsel %vm240_vm14, %v239_v38, %v221_v25  ;;  %v2260_v25 = vor.u32 %v2696_v7, %v2257_v8  ;;  %v2888_v7 = vld [vmem:[%s3985_s20 + $0x30] sm:$0xff]  ;;  %s1973_s20 = sshll.u32 %s3223_s28, 4  ;;  %s1974_s20 = int_to_ptr.vmem [resolvable:$true] %s1973_s20 }
 0x30a   :  { %v243_v47 = vsel %vm242_vm15, %v241_v18, %v224_v32  ;;  %v2239_v32 = vld [vmem:[#allocation13 + $0x20] sm:$0xf]  ;;  %v2721_v18 = vld [vmem:[#allocation14 + $0xc] sm:$0xf] }
 0x30b   :  { %v245_v55 = vsel %vm244_vm7, %v243_v47, %v227_v37  ;;  %v674_v16 = vadd.f32 %v673_v35, %v3542_v10  ;;  %v2692_v35 = vld [vmem:[#allocation13 + $0x24] sm:$0xf]  ;;  %1186 = vmatpush.bf16.msra.mxu0 %v2260_v25 }
 0x30d   :  { %v675_v47 = vrot.slane %v674_v16, 2 }
 0x30e   :  { %v599_v44 = vpop.permute.xlu0 %598  ;;  %v634_v45 = vpop.permute.xlu2 %633 }
 0x30f   :  { %v637_v49 = vmul.f32 %v599_v44, %v3431_v21  ;;  %v642_v50 = vmul.f32 %v634_v45, %v3458_v28  ;;  %v585_v51 = vpop.permute.xlu1 %584  ;;  %v2763_v21 = vld [vmem:[#allocation16 + $0x54] sm:$0xf0]  ;;  %v247_v28 = vsel %vm246_vm8, %v245_v55, %v230_v39  ;;  %v2241_v39 = vld [vmem:[#allocation13 + $0x30] sm:$0xf0]  ;;  %v2124_v44 = vor.u32 %v2725_v13, %v2121_v14  ;;  %v2105_v45 = vld [vmem:[#allocation14 + $0x18] sm:$0xf0] }
 0x310   :  { %v635_v54 = vmul.f32 %v585_v51, %v3416_v17  ;;  %v2698_v17 = vld [vmem:[#allocation13 + $0x4c] sm:$0xf0]  ;;  %v249_v6 = vsel %vm248_vm9, %v247_v28, %v233_v33  ;;  %v2392_v22 = vor.u32 %v2763_v21, %v2391_v62  ;;  %v2359_v33 = vld [vmem:[#allocation16 + $0x8] sm:$0xf]  ;;  %v2688_v55 = vld [vmem:[#allocation13 + $0x4] sm:$0xf]  ;;  %v2244_v58 = vor.u32 %v2692_v35, %v2241_v39 }
 0x311   :  { %v655_v61 = vrot.slane %v637_v49, 4  ;;  %v685_v5 = vrot.slane %v642_v50, 4  ;;  %v251_v11 = vsel %vm250_vm10, %v249_v6, %v236_v46  ;;  %v2256_v31 = vor.u32 %v2698_v17, %v2255_v2  ;;  %1001 = vmatpush.bf16.msrb.mxu2 %v2124_v44 }
 0x312   :  { %v643_v63 = vrot.slane %v635_v54, 4  ;;  %v3553_v23 = vpack.c.bf16 %v251_v11, %v251_v11  ;;  %1443 = vmatpush.bf16.msra.mxu1 %v2392_v22  ;;  %v664_v46 = vadd.f32 %v663_v15, %v662_v60  ;;  %v2108_v59 = vor.u32 %v2721_v18, %v2105_v45  ;;  %1187 = vmatpush.bf16.msra.mxu0 %v2244_v58  ;;  %v2465_v58 = vld [vmem:[#allocation16 + $0xf0] sm:$0xf0] }
 0x313   :  { %v656_v4 = vadd.f32 %v655_v61, %v637_v49  ;;  %v686_v38 = vadd.f32 %v685_v5, %v642_v50  ;;  %1173 = vmatpush.bf16.msrb.mxu3 %v2256_v31  ;;  %v2223_v49 = vld [vmem:[#allocation13] sm:$0xf]  ;;  %v2690_v50 = vld [vmem:[#allocation13 + $0xc] sm:$0xf0]  ;;  %v2360_v62 = vor.u32 %v2755_v43, %v2359_v33  ;;  %v724_v17 = vpack.c.bf16 %v3555_v36, %v3555_v36 }
 0x314   :  { %v644_v9 = vadd.f32 %v643_v63, %v635_v54  ;;  %1202 = vmatmul.bf16.vlgmr.msrb.gmra.mxu1 %v3553_v23  ;;  %v1552_v10 = vunpack.c.l.b16 %v3553_v23  ;;  %v2240_v54 = vor.u32 %v2694_v34, %v2239_v32  ;;  %v665_v21 = vrot.slane %v664_v46, 1 }
 0x315   :  { %v657_v20 = vrot.slane %v656_v4, 2  ;;  %v687_v57 = vrot.slane %v686_v38, 2  ;;  %v676_v63 = vadd.f32 %v675_v47, %v674_v16  ;;  %v2224_v28 = vor.u32 %v2690_v50, %v2223_v49  ;;  %1002 = vmatpush.bf16.msrb.mxu2 %v2108_v59 }
 0x316   :  { %v645_v29 = vrot.slane %v644_v9, 2  ;;  %v1554_v48 = vpack.c.b16 %v1552_v10, %v1552_v10  ;;  %1444 = vmatpush.bf16.msra.mxu1 %v2376_v53  ;;  %v772_v15 = vperm.slane %v724_v17, 0  ;;  %v2345_v53 = vld [vmem:[#allocation13 + $0xf8] sm:$0xf0]  ;;  %v2776_v17 = vld [vmem:[#allocation16 + $0xc4] sm:$0xf] }
 0x317   :  { %v658_v37 = vadd.f32 %v657_v20, %v656_v4  ;;  %v613_v30 = vpop.permute.xlu1 %612  ;;  %1174 = vmatpush.bf16.msrb.mxu3 %v2240_v54  ;;  %v688_v3 = vadd.f32 %v687_v57, %v686_v38  ;;  %v677_v11 = vrot.slane %v676_v63, 1  ;;  %v2463_v54 = vld [vmem:[#allocation16 + $0xe0] sm:$0xf]  ;;  %v2780_v57 = vld [vmem:[#allocation16 + $0xe4] sm:$0xf] }
 0x318   :  { %v646_v40 = vadd.f32 %v645_v29, %v644_v9  ;;  %v639_v41 = vmul.f32 %v613_v30, %v3443_v24  ;;  %v2225_v24 = vld [vmem:[#allocation13 + $0x10] sm:$0xf0]  ;;  %1558 = vst [vmem:[#allocation2 + $0x8] sm:$0xf] %v1554_v48  ;;  %v666_v9 = vadd.f32 %v665_v21, %v664_v46  ;;  %v780_v34 = vunpack.c.l.b16 %v772_v15 }
 0x319   :  { %v659_v42 = vrot.slane %v658_v37, 1  ;;  %v2228_v0 = vor.u32 %v2688_v55, %v2225_v24  ;;  %v689_v16 = vrot.slane %v688_v3, 1  ;;  %v678_v22 = vadd.f32 %v677_v11, %v676_v63  ;;  %v2774_v11 = vld [vmem:[#allocation16 + $0xac] sm:$0xf0] }
 0x31a   :  { %v647_v51 = vrot.slane %v646_v40, 1  ;;  %v667_v52 = vrot.slane %v639_v41, 4  ;;  %1445 = vmatpush.bf16.msra.mxu1 %v2360_v62  ;;  %v726_v29 = vpack.c.bf16 %v666_v9, %v666_v9  ;;  %v2468_v63 = vor.u32 %v2780_v57, %v2465_v58  ;;  %v2431_v9 = vld [vmem:[#allocation16 + $0xa0] sm:$0xf]  ;;  %v2689_v57 = vld [vmem:[#allocation13 + $0xc] sm:$0xf] }
 0x31b   :  { %v660_v56 = vadd.f32 %v659_v42, %v658_v37  ;;  %1175 = vmatpush.bf16.msrb.mxu3 %v2224_v28  ;;  %1188 = vmatpush.bf16.msra.mxu0 %v2228_v0  ;;  %v690_v36 = vadd.f32 %v689_v16, %v688_v3  ;;  %v728_v35 = vpack.c.bf16 %v678_v22, %v678_v22  ;;  %v2713_v28 = vld [vmem:[#allocation13 + $0xcc] sm:$0xf]  ;;  %v2329_v0 = vld [vmem:[#allocation13 + $0xd8] sm:$0xf0]  ;;  %v2449_v3 = vld [vmem:[#allocation16 + $0xd0] sm:$0xf0] }
 0x31c   :  { %v648_v61 = vadd.f32 %v647_v51, %v646_v40  ;;  %v668_v60 = vadd.f32 %v667_v52, %v639_v41  ;;  %v774_v10 = vperm.slane %v726_v29, 0  ;;  %v2717_v52 = vld [vmem:[#allocation13 + $0xec] sm:$0xf]  ;;  %v2432_v15 = vor.u32 %v2774_v11, %v2431_v9  ;;  %v2770_v29 = vld [vmem:[#allocation16 + $0x8c] sm:$0xf0] }
 0x31d   :  { %v725_v5 = vpack.c.bf16 %v660_v56, %v660_v56  ;;  %v730_v40 = vpack.c.bf16 %v690_v36, %v690_v36  ;;  %v776_v43 = vperm.slane %v728_v35, 0  ;;  %v2782_v56 = vld [vmem:[#allocation16 + $0xec] sm:$0xf0]  ;;  %v2768_v22 = vld [vmem:[#allocation16 + $0x84] sm:$0xf] }
 0x31e   :  { %v723_v1 = vpack.c.bf16 %v648_v61, %v648_v61  ;;  %v669_v2 = vrot.slane %v668_v60, 2  ;;  %v782_v33 = vunpack.c.l.b16 %v774_v10  ;;  %v2464_v21 = vor.u32 %v2782_v56, %v2463_v54  ;;  %v2701_v36 = vld [vmem:[#allocation13 + $0x6c] sm:$0xf]  ;;  %v2764_v10 = vld [vmem:[#allocation16 + $0x64] sm:$0xf] }
 0x31f   :  { %v627_v4 = vpop.permute.xlu1 %626  ;;  %v773_v20 = vperm.slane %v725_v5, 0  ;;  %v778_v47 = vperm.slane %v730_v40, 0  ;;  %v784_v50 = vunpack.c.l.b16 %v776_v43  ;;  %v2401_v35 = vld [vmem:[#allocation16 + $0x70] sm:$0xf0]  ;;  %v2760_v43 = vld [vmem:[#allocation16 + $0x44] sm:$0xf] }
 0x320   :  { %v670_v6 = vadd.f32 %v669_v2, %v668_v60  ;;  %v641_v8 = vmul.f32 %v2888_v7, %v627_v4  ;;  %v771_v12 = vperm.slane %v723_v1, 0  ;;  %v2348_v60 = vor.u32 %v2717_v52, %v2345_v53  ;;  %v2447_v1 = vld [vmem:[#allocation16 + $0xc0] sm:$0xf]  ;;  %v2778_v2 = vld [vmem:[#allocation16 + $0xcc] sm:$0xf0] }
 0x321   :  { %v781_v37 = vunpack.c.l.b16 %v773_v20  ;;  %v786_v55 = vunpack.c.l.b16 %v778_v47  ;;  %v2332_v4 = vor.u32 %v2713_v28, %v2329_v0  ;;  %v2448_v5 = vor.u32 %v2778_v2, %v2447_v1  ;;  %v2709_v7 = vld [vmem:[#allocation13 + $0xac] sm:$0xf]  ;;  %v2758_v52 = vld [vmem:[#allocation16 + $0x2c] sm:$0xf0]  ;;  %v2756_v53 = vld [vmem:[#allocation16 + $0x24] sm:$0xf] }
 0x322   :  { %v671_v13 = vrot.slane %v670_v6, 1  ;;  %v679_v14 = vrot.slane %v641_v8, 4  ;;  %v779_v31 = vunpack.c.l.b16 %v771_v12  ;;  %v2772_v12 = vld [vmem:[#allocation16 + $0xa4] sm:$0xf]  ;;  %v2705_v20 = vld [vmem:[#allocation13 + $0x8c] sm:$0xf]  ;;  %v2404_v40 = vor.u32 %v2764_v10, %v2401_v35 }
 0x323   :  { %v2369_v54 = vld [vmem:[#allocation16 + $0x30] sm:$0xf0]  ;;  %v2233_v58 = vld [vmem:[#allocation13 + $0x18] sm:$0xf0]  ;;  %v2769_v9 = vld [vmem:[#allocation16 + $0x8c] sm:$0xf] }
 0x324   :  { %v672_v26 = vadd.f32 %v671_v13, %v670_v6  ;;  %v680_v27 = vadd.f32 %v679_v14, %v641_v8  ;;  %1446 = vmatmul.bf16.vlgmr.msra.gmra.mxu1 %v3423_v19  ;;  %v787_v39 = vsel %vm537_vm0, %v780_v34, %v779_v31  ;;  %v2452_v6 = vor.u32 %v2776_v17, %v2449_v3  ;;  %v2313_v8 = vld [vmem:[#allocation13 + $0xb8] sm:$0xf0]  ;;  %v2433_v13 = vld [vmem:[#allocation16 + $0xb0] sm:$0xf0]  ;;  %v2777_v3 = vld [vmem:[#allocation16 + $0xcc] sm:$0xf] }
 0x325   :  { %v788_v41 = vsel %vm539_vm1, %v781_v37, %v787_v39  ;;  %v2316_v14 = vor.u32 %v2709_v7, %v2313_v8  ;;  %v2436_v16 = vor.u32 %v2772_v12, %v2433_v13  ;;  %v2417_v31 = vld [vmem:[#allocation16 + $0x90] sm:$0xf0]  ;;  %v2281_v37 = vld [vmem:[#allocation13 + $0x78] sm:$0xf0]  ;;  %v2372_v56 = vor.u32 %v2756_v53, %v2369_v54  ;;  %v2765_v13 = vld [vmem:[#allocation16 + $0x6c] sm:$0xf] }
 0x326   :  { %v727_v25 = vpack.c.bf16 %v672_v26, %v672_v26  ;;  %v681_v32 = vrot.slane %v680_v27, 2  ;;  %v789_v42 = vsel %vm541_vm2, %v782_v33, %v788_v41  ;;  %v2297_v26 = vld [vmem:[#allocation13 + $0x98] sm:$0xf0]  ;;  %v2420_v34 = vor.u32 %v2768_v22, %v2417_v31  ;;  %v2697_v41 = vld [vmem:[#allocation13 + $0x4c] sm:$0xf] }
 0x327   :  { %v2284_v39 = vor.u32 %v2701_v36, %v2281_v37  ;;  %v2762_v33 = vld [vmem:[#allocation16 + $0x4c] sm:$0xf0]  ;;  %v2473_v28 = vld [vmem:[#allocation16 + $0xf8] sm:$0xf0]  ;;  %v2236_v0 = vor.u32 %v2689_v57, %v2233_v58  ;;  %v2753_v22 = vld [vmem:[#allocation16 + $0xc] sm:$0xf] }
 0x328   :  { %v775_v38 = vperm.slane %v727_v25, 0  ;;  %v682_v30 = vadd.f32 %v681_v32, %v680_v27  ;;  %v2415_v27 = vld [vmem:[#allocation16 + $0x80] sm:$0xf]  ;;  %v2300_v25 = vor.u32 %v2705_v20, %v2297_v26  ;;  %v2441_v7 = vld [vmem:[#allocation16 + $0xb8] sm:$0xf0] }
 0x329   :  { %v2416_v32 = vor.u32 %v2770_v29, %v2415_v27  ;;  %v2425_v11 = vld [vmem:[#allocation16 + $0x98] sm:$0xf0]  ;;  %v2757_v26 = vld [vmem:[#allocation16 + $0x2c] sm:$0xf]  ;;  %v2602_v53 = vld [vmem:[%s3969_s14 + $0xf0] sm:$0xf] }
 0x32a   :  { %v683_v18 = vrot.slane %v682_v30, 1  ;;  %v783_v44 = vunpack.c.l.b16 %v775_v38  ;;  %v2399_v38 = vld [vmem:[#allocation16 + $0x60] sm:$0xf]  ;;  %v2428_v12 = vor.u32 %v2769_v9, %v2425_v11  ;;  %v2393_v20 = vld [vmem:[#allocation16 + $0x58] sm:$0xf0] }
 0x32b   :  { %v2377_v27 = vld [vmem:[#allocation16 + $0x38] sm:$0xf0]  ;;  %v2811_v9 = vld [vmem:[%s3969_s14 + $0xd4] sm:$0xf0] }
 0x32c   :  { %v684_v45 = vadd.f32 %v683_v18, %v682_v30  ;;  %v790_v48 = vsel %vm543_vm3, %v783_v44, %v789_v42  ;;  %v2766_v30 = vld [vmem:[#allocation16 + $0x6c] sm:$0xf0]  ;;  %v2265_v44 = vld [vmem:[#allocation13 + $0x58] sm:$0xf0]  ;;  %v2380_v29 = vor.u32 %v2757_v26, %v2377_v27 }
 0x32d   :  { %v791_v24 = vsel %vm545_vm4, %v784_v50, %v790_v48  ;;  %v2400_v18 = vor.u32 %v2766_v30, %v2399_v38  ;;  %v2268_v47 = vor.u32 %v2697_v41, %v2265_v44  ;;  %v2249_v50 = vld [vmem:[#allocation13 + $0x38] sm:$0xf0] }
 0x32e   :  { %v729_v46 = vpack.c.bf16 %v684_v45, %v684_v45  ;;  %v2383_v45 = vld [vmem:[#allocation16 + $0x40] sm:$0xf]  ;;  %v2361_v31 = vld [vmem:[#allocation16 + $0x18] sm:$0xf0] }
 0x32f   :  { %v2384_v42 = vor.u32 %v2762_v33, %v2383_v45 }
 0x330   :  { %v777_v49 = vperm.slane %v729_v46, 0  ;;  %v2385_v46 = vld [vmem:[#allocation16 + $0x50] sm:$0xf0] }
 0x331   :  { %v2388_v48 = vor.u32 %v2760_v43, %v2385_v46 }
 0x332   :  { %v785_v51 = vunpack.c.l.b16 %v777_v49  ;;  %v2693_v49 = vld [vmem:[#allocation13 + $0x2c] sm:$0xf] }
 0x334   :  { %v792_v59 = vsel %vm547_vm5, %v785_v51, %v791_v24  ;;  %v2367_v51 = vld [vmem:[#allocation16 + $0x20] sm:$0xf] }
 0x335   :  { %v793_v61 = vsel %vm549_vm6, %v786_v55, %v792_v59  ;;  %v2252_v55 = vor.u32 %v2693_v49, %v2249_v50  ;;  %v2368_v24 = vor.u32 %v2758_v52, %v2367_v51  ;;  %v2351_v59 = vld [vmem:[#allocation16] sm:$0xf]  ;;  %v2538_v51 = vld [vmem:[%s3969_s14 + $0x70] sm:$0xf]  ;;  %v2799_v52 = vld [vmem:[%s3969_s14 + $0x74] sm:$0xf0] }
 0x336   :  { %v3573_v62 = vpack.c.b16 %v793_v61, %v793_v61  ;;  %v2754_v61 = vld [vmem:[#allocation16 + $0xc] sm:$0xf0]  ;;  %v2539_v54 = vor.u32 %v2799_v52, %v2538_v51  ;;  %v2794_v52 = vld [vmem:[%s3969_s14 + $0x54] sm:$0xf] }
 0x337   :  { %v2352_v1 = vor.u32 %v2754_v61, %v2351_v59 }
 0x338   :  { %964 = vmatmul.bf16.vlgmr.msra.gmra.mxu2 %v3573_v62  ;;  %977 = vmatmul.bf16.vlgmr.msra.gmra.mxu3 %v3573_v62 }
 0x339   :  { %990 = vmatmul.bf16.vlgmr.msrb.gmra.mxu0 %v3573_v62  ;;  %1207 = vmatpush.bf16.msra.mxu2 %v2348_v60  ;;  %v2752_v60 = vld [vmem:[#allocation16 + $0x4] sm:$0xf] }
 0x33a   :  { %1412 = vmatpush.bf16.msra.mxu3 %v2464_v21  ;;  %1425 = vmatpush.bf16.msrb.mxu0 %v2468_v63  ;;  %v2353_v21 = vld [vmem:[#allocation16 + $0x10] sm:$0xf0]  ;;  %v2781_v63 = vld [vmem:[#allocation16 + $0xec] sm:$0xf] }
 0x33b   :  { %v2356_v2 = vor.u32 %v2752_v60, %v2353_v21  ;;  %v2476_v17 = vor.u32 %v2781_v63, %v2473_v28  ;;  %v2530_v60 = vld [vmem:[%s3969_s14 + $0x60] sm:$0xf]  ;;  %v2797_v21 = vld [vmem:[%s3969_s14 + $0x64] sm:$0xf0] }
 0x33c   :  { %v2531_v28 = vor.u32 %v2797_v21, %v2530_v60  ;;  %v2490_v60 = vld [vmem:[%s3969_s14 + $0x10] sm:$0xf]  ;;  %v2787_v21 = vld [vmem:[%s3969_s14 + $0x14] sm:$0xf0] }
 0x33d   :  { %1208 = vmatpush.bf16.msra.mxu2 %v2332_v4  ;;  %v2457_v4 = vld [vmem:[#allocation16 + $0xd8] sm:$0xf0] }
 0x33e   :  { %1413 = vmatpush.bf16.msra.mxu3 %v2448_v5  ;;  %1426 = vmatpush.bf16.msrb.mxu0 %v2452_v6  ;;  %v2460_v5 = vor.u32 %v2777_v3, %v2457_v4  ;;  %v2773_v6 = vld [vmem:[#allocation16 + $0xac] sm:$0xf] }
 0x33f   :  { %v2444_v8 = vor.u32 %v2773_v6, %v2441_v7  ;;  %v2795_v6 = vld [vmem:[%s3969_s14 + $0x54] sm:$0xf0]  ;;  %v2586_v7 = vld [vmem:[%s3969_s14 + $0xd0] sm:$0xf] }
 0x341   :  { %1209 = vmatpush.bf16.msra.mxu2 %v2316_v14  ;;  %v2409_v14 = vld [vmem:[#allocation16 + $0x78] sm:$0xf0] }
 0x342   :  { %1414 = vmatpush.bf16.msra.mxu3 %v2432_v15  ;;  %1427 = vmatpush.bf16.msrb.mxu0 %v2436_v16  ;;  %v2412_v15 = vor.u32 %v2765_v13, %v2409_v14  ;;  %v2761_v16 = vld [vmem:[#allocation16 + $0x4c] sm:$0xf] }
 0x345   :  { %1210 = vmatpush.bf16.msra.mxu2 %v2300_v25  ;;  %v2364_v25 = vor.u32 %v2753_v22, %v2361_v31  ;;  %v2798_v22 = vld [vmem:[%s3969_s14 + $0x74] sm:$0xf] }
 0x346   :  { %1415 = vmatpush.bf16.msra.mxu3 %v2416_v32  ;;  %1428 = vmatpush.bf16.msrb.mxu0 %v2420_v34 }
 0x348   :  { %1003 = vmatmul.bf16.vlgmr.msrb.gmra.mxu2 %v3573_v62  ;;  %1176 = vmatmul.bf16.vlgmr.msrb.gmra.mxu3 %v3553_v23 }
 0x349   :  { %1189 = vmatmul.bf16.vlgmr.msra.gmra.mxu0 %v3553_v23  ;;  %1211 = vmatpush.bf16.msra.mxu2 %v2284_v39 }
 0x34a   :  { %1416 = vmatpush.bf16.msra.mxu3 %v2400_v18  ;;  %1429 = vmatpush.bf16.msrb.mxu0 %v2404_v40 }
 0x34d   :  { %1212 = vmatpush.bf16.msra.mxu2 %v2268_v47  ;;  %v3589_v47 = vld [vmem:[#allocation17] sm:$0xf] }
 0x34e   :  { %1417 = vmatpush.bf16.msra.mxu3 %v2384_v42  ;;  %1430 = vmatpush.bf16.msrb.mxu0 %v2388_v48  ;;  %v1471_v48 = vperm.slane %v3589_v47, 1  ;;  %v1470_v57 = vperm.slane %v3589_v47, 0 }
 0x351   :  { %1213 = vmatpush.bf16.msra.mxu2 %v2252_v55  ;;  %v2815_v55 = vld [vmem:[%s3969_s14 + $0xf4] sm:$0xf0] }
 0x352   :  { %1418 = vmatpush.bf16.msra.mxu3 %v2368_v24  ;;  %1431 = vmatpush.bf16.msrb.mxu0 %v2372_v56  ;;  %v2603_v56 = vor.u32 %v2815_v55, %v2602_v53  ;;  %v2524_v53 = vld [vmem:[%s3969_s14 + $0x58] sm:$0xf0] }
 0x353   :  { %v2527_v55 = vor.u32 %v2794_v52, %v2524_v53  ;;  %v2596_v53 = vld [vmem:[%s3969_s14 + $0xe8] sm:$0xf0] }
 0x355   :  { %1214 = vmatpush.bf16.msra.mxu2 %v2236_v0  ;;  %v2594_v0 = vld [vmem:[%s3969_s14 + $0xe0] sm:$0xf] }
 0x356   :  { %1419 = vmatpush.bf16.msra.mxu3 %v2352_v1  ;;  %1432 = vmatpush.bf16.msrb.mxu0 %v2356_v2  ;;  %v2813_v1 = vld [vmem:[%s3969_s14 + $0xe4] sm:$0xf0] }
 0x358   :  { %1215 = vmatmul.bf16.vlgmr.msra.gmra.mxu2 %v3553_v23  ;;  %v2396_v23 = vor.u32 %v2761_v16, %v2393_v20  ;;  %v2793_v16 = vld [vmem:[%s3969_s14 + $0x44] sm:$0xf0]  ;;  %v2578_v20 = vld [vmem:[%s3969_s14 + $0xc0] sm:$0xf] }
 0x359   :  { %1451 = vmatpush.bf16.msrb.mxu2 %v2476_v17  ;;  %1420 = vmatmul.bf16.vlgmr.msra.gmra.mxu3 %v3423_v19  ;;  %v2595_v17 = vor.u32 %v2813_v1, %v2594_v0  ;;  %v2803_v0 = vld [vmem:[%s3969_s14 + $0x94] sm:$0xf0]  ;;  %v2792_v1 = vld [vmem:[%s3969_s14 + $0x44] sm:$0xf] }
 0x35a   :  { %1433 = vmatmul.bf16.vlgmr.msrb.gmra.mxu0 %v3423_v19  ;;  %1866 = vmatpush.bf16.msrb.mxu3 %v2539_v54 }
 0x35b   :  { %1879 = vmatpush.bf16.msra.mxu0 %v2603_v56  ;;  %v2831_v56 = vld [vmem:[%s3969_s14 + $0x174] sm:$0xf0] }
 0x35d   :  { %1452 = vmatpush.bf16.msrb.mxu2 %v2460_v5  ;;  %v2522_v5 = vld [vmem:[%s3969_s14 + $0x50] sm:$0xf] }
 0x35e   :  { %1867 = vmatpush.bf16.msrb.mxu3 %v2531_v28  ;;  %v2554_v28 = vld [vmem:[%s3969_s14 + $0x90] sm:$0xf] }
 0x35f   :  { %1880 = vmatpush.bf16.msra.mxu0 %v2595_v17  ;;  %v2555_v17 = vor.u32 %v2803_v0, %v2554_v28 }
 0x361   :  { %1453 = vmatpush.bf16.msrb.mxu2 %v2444_v8  ;;  %v2523_v8 = vor.u32 %v2795_v6, %v2522_v5  ;;  %v1473_v6 = vperm.slane %v3589_v47, 3 }
 0x363   :  { %1868 = vmatpush.bf16.msrb.mxu3 %v2523_v8  ;;  %v2658_v8 = vld [vmem:[%s3969_s14 + $0x160] sm:$0xf] }
 0x365   :  { %1454 = vmatpush.bf16.msrb.mxu2 %v2428_v12  ;;  %v2587_v12 = vor.u32 %v2811_v9, %v2586_v7  ;;  %v2829_v9 = vld [vmem:[%s3969_s14 + $0x164] sm:$0xf0] }
 0x367   :  { %1881 = vmatpush.bf16.msra.mxu0 %v2587_v12 }
 0x369   :  { %1455 = vmatpush.bf16.msrb.mxu2 %v2412_v15  ;;  %v2514_v15 = vld [vmem:[%s3969_s14 + $0x40] sm:$0xf] }
 0x36a   :  { %v2515_v27 = vor.u32 %v2793_v16, %v2514_v15  ;;  %v2546_v15 = vld [vmem:[%s3969_s14 + $0x80] sm:$0xf]  ;;  %v2484_v16 = vld [vmem:[%s3969_s14 + $0x8] sm:$0xf0] }
 0x36c   :  { %1869 = vmatpush.bf16.msrb.mxu3 %v2515_v27  ;;  %v2801_v27 = vld [vmem:[%s3969_s14 + $0x84] sm:$0xf0] }
 0x36d   :  { %1456 = vmatpush.bf16.msrb.mxu2 %v2396_v23 }
 0x371   :  { %1457 = vmatpush.bf16.msrb.mxu2 %v2380_v29  ;;  %v2809_v29 = vld [vmem:[%s3969_s14 + $0xc4] sm:$0xf0] }
 0x372   :  { %v2579_v31 = vor.u32 %v2809_v29, %v2578_v20  ;;  %v2790_v29 = vld [vmem:[%s3969_s14 + $0x34] sm:$0xf] }
 0x374   :  { %1882 = vmatpush.bf16.msra.mxu0 %v2579_v31 }
 0x375   :  { %1458 = vmatpush.bf16.msrb.mxu2 %v2364_v25  ;;  %v2540_v25 = vld [vmem:[%s3969_s14 + $0x78] sm:$0xf0] }
 0x378   :  { %1459 = vmatmul.bf16.vlgmr.msrb.gmra.mxu2 %v3423_v19 }
 0x391   :  { %v1203_v32 = vpop.f32.mrf.mxu1 }
 0x399   :  { %v1205_v34 = vpop.f32.mrf.mxu1 }
 0x39a   :  { %v2506_v34 = vld [vmem:[%s3969_s14 + $0x30] sm:$0xf] }
 0x3a1   :  { %v1447_v36 = vpop.f32.mrf.mxu1 }
 0x3a9   :  { %v1449_v37 = vpop.f32.mrf.mxu1 }
 0x3aa   :  { %v2570_v37 = vld [vmem:[%s3969_s14 + $0xb0] sm:$0xf] }
 0x3b6   :  { %v991_v38 = vpop.f32.mrf.mxu0 }
 0x3b7   :  { %v1204_v30 = vadd.f32 %v1203_v32, %v991_v38  ;;  %v2543_v32 = vor.u32 %v2798_v22, %v2540_v25  ;;  %v2547_v25 = vor.u32 %v2801_v27, %v2546_v15  ;;  %v2784_v15 = vld [vmem:[%s3969_s14 + $0x4] sm:$0xf] }
 0x3b8   :  { %v2487_v27 = vor.u32 %v2784_v15, %v2484_v16  ;;  %v2824_v22 = vld [vmem:[%s3969_s14 + $0x144] sm:$0xf] }
 0x3b9   :  { %v3585_v10 = vadd.f32 %v1447_v36, %v1204_v30  ;;  %v2791_v36 = vld [vmem:[%s3969_s14 + $0x34] sm:$0xf0]  ;;  %1905 = vmatpush.bf16.msra.mxu2 %v2543_v32  ;;  %v2508_v32 = vld [vmem:[%s3969_s14 + $0x38] sm:$0xf0] }
 0x3ba   :  { %v2507_v38 = vor.u32 %v2791_v36, %v2506_v34  ;;  %v2807_v30 = vld [vmem:[%s3969_s14 + $0xb4] sm:$0xf0]  ;;  %v2814_v34 = vld [vmem:[%s3969_s14 + $0xf4] sm:$0xf] }
 0x3bb   :  { %v965_v35 = vpop.f32.mrf.mxu2  ;;  %v978_v39 = vpop.f32.mrf.mxu3 }
 0x3bc   :  { %1870 = vmatpush.bf16.msrb.mxu3 %v2507_v38  ;;  %v2604_v38 = vld [vmem:[%s3969_s14 + $0xf8] sm:$0xf0] }
 0x3be   :  { %v993_v18 = vpop.f32.mrf.mxu0 }
 0x3bf   :  { %v2571_v18 = vor.u32 %v2807_v30, %v2570_v37  ;;  %v2511_v37 = vor.u32 %v2790_v29, %v2508_v32  ;;  %v2830_v30 = vld [vmem:[%s3969_s14 + $0x174] sm:$0xf]  ;;  %v2580_v29 = vld [vmem:[%s3969_s14 + $0xc8] sm:$0xf0]  ;;  %v2821_v32 = vld [vmem:[%s3969_s14 + $0x124] sm:$0xf0] }
 0x3c1   :  { %1883 = vmatpush.bf16.msra.mxu0 %v2571_v18 }
 0x3c3   :  { %v967_v40 = vpop.f32.mrf.mxu2  ;;  %v980_v41 = vpop.f32.mrf.mxu3 }
 0x3c4   :  { %v2532_v40 = vld [vmem:[%s3969_s14 + $0x68] sm:$0xf0] }
 0x3c6   :  { %v1190_v44 = vpop.f32.mrf.mxu0 }
 0x3c7   :  { %v1191_v42 = vadd.f32 %v1190_v44, %v978_v39 }
 0x3cb   :  { %v3587_v45 = vpop.f32.mrf.mxu2  ;;  %v1177_v33 = vpop.f32.mrf.mxu3 }
 0x3cc   :  { %v1178_v58 = vadd.f32 %v1177_v33, %v965_v35  ;;  %v2796_v35 = vld [vmem:[%s3969_s14 + $0x64] sm:$0xf]  ;;  %v2498_v33 = vld [vmem:[%s3969_s14 + $0x20] sm:$0xf] }
 0x3cd   :  { %v2535_v44 = vor.u32 %v2796_v35, %v2532_v40  ;;  %v2668_v35 = vld [vmem:[%s3969_s14 + $0x178] sm:$0xf0]  ;;  %v2607_v40 = vor.u32 %v2814_v34, %v2604_v38 }
 0x3ce   :  { %v1192_v43 = vpop.f32.mrf.mxu0  ;;  %v2572_v38 = vld [vmem:[%s3969_s14 + $0xb8] sm:$0xf0] }
 0x3cf   :  { %v2789_v43 = vld [vmem:[%s3969_s14 + $0x24] sm:$0xf0]  ;;  %1906 = vmatpush.bf16.msra.mxu2 %v2535_v44  ;;  %v2650_v44 = vld [vmem:[%s3969_s14 + $0x150] sm:$0xf] }
 0x3d3   :  { %v1006_v46 = vpop.f32.mrf.mxu2  ;;  %v1179_v19 = vpop.f32.mrf.mxu3  ;;  %1907 = vmatpush.bf16.msra.mxu2 %v2527_v55  ;;  %v2660_v55 = vld [vmem:[%s3969_s14 + $0x168] sm:$0xf0] }
 0x3d4   :  { %v2562_v46 = vld [vmem:[%s3969_s14 + $0xa0] sm:$0xf] }
 0x3d7   :  { %v1434_v49 = vpop.f32.mrf.mxu0 }
 0x3d8   :  { %v1465_v50 = vadd.f32 %v1434_v49, %v1191_v42  ;;  %v2805_v42 = vld [vmem:[%s3969_s14 + $0xa4] sm:$0xf0] }
 0x3d9   :  { %v2563_v51 = vor.u32 %v2805_v42, %v2562_v46 }
 0x3da   :  { %v1479_v24 = vadd.f32 %v1471_v48, %v1465_v50  ;;  %v1472_v48 = vperm.slane %v3589_v47, 2  ;;  %v2499_v50 = vor.u32 %v2789_v43, %v2498_v33  ;;  %v2827_v33 = vld [vmem:[%s3969_s14 + $0x154] sm:$0xf0]  ;;  %v1540_v43 = vld [vmem:[#allocation5] sm:$0xff]  ;;  %v2588_v47 = vld [vmem:[%s3969_s14 + $0xd8] sm:$0xf0] }
 0x3db   :  { %v3605_v61 = vpop.f32.mrf.mxu2  ;;  %1884 = vmatpush.bf16.msra.mxu0 %v2563_v51  ;;  %v2651_v42 = vor.u32 %v2827_v33, %v2650_v44  ;;  %v2618_v33 = vld [vmem:[%s3969_s14 + $0x110] sm:$0xf] }
 0x3dc   :  { %v2478_v59 = vmul.f32 -1.442695, %v1479_v24  ;;  %v1421_v63 = vpop.f32.mrf.mxu3  ;;  %v2666_v24 = vld [vmem:[%s3969_s14 + $0x170] sm:$0xf]  ;;  %1871 = vmatpush.bf16.msrb.mxu3 %v2499_v50  ;;  %v1480_v5 = vadd.f32 %v1472_v48, %v3585_v10  ;;  %v2659_v10 = vor.u32 %v2829_v9, %v2658_v8  ;;  %v1217_v46 = vadd.f32 %v3605_v61, %v3587_v45  ;;  %v2788_v48 = vld [vmem:[%s3969_s14 + $0x24] sm:$0xf] }
 0x3dd   :  { %v1464_v2 = vadd.f32 %v1421_v63, %v1178_v58  ;;  %v2491_v63 = vor.u32 %v2787_v21, %v2490_v60  ;;  %v2812_v50 = vld [vmem:[%s3969_s14 + $0xe4] sm:$0xf] }
 0x3de   :  { %2872 = vpow2.f32 %v2478_v59  ;;  %v2667_v59 = vor.u32 %v2831_v56, %v2666_v24  ;;  %v2599_v56 = vor.u32 %v2812_v50, %v2596_v53 }
 0x3df   :  { %v1436_v3 = vpop.f32.mrf.mxu0  ;;  %v1478_v4 = vadd.f32 %v1470_v57, %v1464_v2  ;;  %1885 = vmatpush.bf16.msra.mxu0 %v2555_v17  ;;  %v2810_v17 = vld [vmem:[%s3969_s14 + $0xd4] sm:$0xf] }
 0x3e0   :  { %1892 = vmatpush.bf16.msrb.mxu1 %v2667_v59  ;;  %v2516_v3 = vld [vmem:[%s3969_s14 + $0x48] sm:$0xf0]  ;;  %1872 = vmatpush.bf16.msrb.mxu3 %v2491_v63  ;;  %v2825_v59 = vld [vmem:[%s3969_s14 + $0x144] sm:$0xf0]  ;;  %v2591_v9 = vor.u32 %v2810_v17, %v2588_v47 }
 0x3e1   :  { %v2477_v11 = vmul.f32 -1.442695, %v1478_v4  ;;  %v2519_v7 = vor.u32 %v2792_v1, %v2516_v3  ;;  %v2786_v1 = vld [vmem:[%s3969_s14 + $0x14] sm:$0xf] }
 0x3e3   :  { %2874 = vpow2.f32 %v2477_v11  ;;  %v1218_v14 = vpop.f32.mrf.mxu2  ;;  %1908 = vmatpush.bf16.msra.mxu2 %v2519_v7  ;;  %1886 = vmatpush.bf16.msra.mxu0 %v2547_v25  ;;  %v2652_v7 = vld [vmem:[%s3969_s14 + $0x158] sm:$0xf0]  ;;  %v2626_v25 = vld [vmem:[%s3969_s14 + $0x120] sm:$0xf] }
 0x3e4   :  { %v2873_v13 = vpop.eup %2872  ;;  %v1423_v26 = vpop.f32.mrf.mxu3  ;;  %v2785_v14 = vld [vmem:[%s3969_s14 + $0x4] sm:$0xf0]  ;;  %1893 = vmatpush.bf16.msrb.mxu1 %v2659_v10  ;;  %v2823_v10 = vld [vmem:[%s3969_s14 + $0x134] sm:$0xf0] }
 0x3e5   :  { %v3640_v23 = vadd.f32 1.0, %v2873_v13  ;;  %v2482_v13 = vld [vmem:[%s3969_s14] sm:$0xf] }
 0x3e6   :  { %v2483_v26 = vor.u32 %v2785_v14, %v2482_v13  ;;  %1887 = vmatmul.bf16.vlgmr.msra.gmra.mxu0 %v3573_v62 }
 0x3e7   :  { %2876 = vrcp.f32 %v3640_v23  ;;  %v1514_v54 = vand.u32 2147483647, %v3640_v23  ;;  %v1516_v58 = vand.u32 2147483648, %v3640_v23  ;;  %vm1510_vm1 = vweird.f32 %v3640_v23  ;;  %1909 = vmatpush.bf16.msra.mxu2 %v2511_v37  ;;  %v2806_v37 = vld [vmem:[%s3969_s14 + $0xb4] sm:$0xf] }
 0x3e8   :  { %1873 = vmatpush.bf16.msrb.mxu3 %v2483_v26  ;;  %1894 = vmatpush.bf16.msrb.mxu1 %v2651_v42  ;;  %v2564_v42 = vld [vmem:[%s3969_s14 + $0xa8] sm:$0xf0] }
 0x3e9   :  { %v2875_v39 = vpop.eup %2874  ;;  %vm3747_vm2 = vcmp.eq.f32.partialorder %v1514_v54, 8.507059e+37  ;;  %v1517_v20 = vor.u32 1.1754944e-38, %v1516_v58  ;;  %v2828_v54 = vld [vmem:[%s3969_s14 + $0x164] sm:$0xf]  ;;  %v2642_v58 = vld [vmem:[%s3969_s14 + $0x140] sm:$0xf] }
 0x3ea   :  { %v3670_v41 = vadd.f32 1.0, %v2875_v39  ;;  %v2643_v21 = vor.u32 %v2825_v59, %v2642_v58  ;;  %v2800_v59 = vld [vmem:[%s3969_s14 + $0x84] sm:$0xf] }
 0x3ec   :  { %2878 = vrcp.f32 %v3670_v41  ;;  %v1497_v31 = vand.u32 2147483648, %v3670_v41  ;;  %v1495_v18 = vand.u32 2147483647, %v3670_v41  ;;  %vm1491_vm5 = vweird.f32 %v3670_v41  ;;  %1918 = vmatpush.bf16.msra.mxu3 %v2607_v40  ;;  %1895 = vmatpush.bf16.msrb.mxu1 %v2643_v21 }
 0x3ed   :  { %v3681_v19 = vpop.eup %2876  ;;  %2880 = vtanh.f32 %v1480_v5 }
 0x3ee   :  { %v1506_v49 = vmul.f32 %v3681_v19, %v3640_v23  ;;  %vm1511_vm0 = vweird.f32 %v3681_v19  ;;  %vm1496_vm11 = vcmp.eq.f32.partialorder %v1495_v18, 8.507059e+37  ;;  %v2636_v18 = vld [vmem:[%s3969_s14 + $0x138] sm:$0xf0] }
 0x3ef   :  { %vm3759_vm3 = vmor %vm1510_vm1, %vm1511_vm0 }
 0x3f0   :  { %v1507_v57 = vsub.f32 1.0, %v1506_v49  ;;  %v2500_v49 = vld [vmem:[%s3969_s14 + $0x28] sm:$0xf0]  ;;  %1919 = vmatpush.bf16.msra.mxu3 %v2599_v56 }
 0x3f1   :  { %v2503_v61 = vor.u32 %v2788_v48, %v2500_v49  ;;  %v2820_v48 = vld [vmem:[%s3969_s14 + $0x124] sm:$0xf]  ;;  %v2628_v49 = vld [vmem:[%s3969_s14 + $0x128] sm:$0xf0] }
 0x3f2   :  { %v1508_v2 = vmul.f32 %v3681_v19, %v1507_v57  ;;  %v3723_v4 = vpop.eup %2878  ;;  %v2663_v57 = vor.u32 %v2828_v54, %v2660_v55  ;;  %v2556_v54 = vld [vmem:[%s3969_s14 + $0x98] sm:$0xf0]  ;;  %v2818_v55 = vld [vmem:[%s3969_s14 + $0x114] sm:$0xf] }
 0x3f3   :  { %v1487_v12 = vmul.f32 %v3723_v4, %v3670_v41  ;;  %vm1492_vm4 = vweird.f32 %v3723_v4  ;;  %v1498_v41 = vor.u32 1.1754944e-38, %v1497_v31  ;;  %v2881_v63 = vpop.eup %2880  ;;  %1910 = vmatpush.bf16.msra.mxu2 %v2503_v61  ;;  %v2644_v31 = vld [vmem:[%s3969_s14 + $0x148] sm:$0xf0]  ;;  %v2802_v61 = vld [vmem:[%s3969_s14 + $0x94] sm:$0xf] }
 0x3f4   :  { %v1509_v11 = vadd.f32 %v3681_v19, %v1508_v2  ;;  %vm1493_vm6 = vmor %vm1491_vm5, %vm1492_vm4  ;;  %v2492_v2 = vld [vmem:[%s3969_s14 + $0x18] sm:$0xf0]  ;;  %1920 = vmatpush.bf16.msra.mxu3 %v2591_v9  ;;  %v2647_v34 = vor.u32 %v2824_v22, %v2644_v31  ;;  %v2559_v56 = vor.u32 %v2802_v61, %v2556_v54 }
 0x3f5   :  { %v1488_v23 = vsub.f32 1.0, %v1487_v12  ;;  %v2495_v5 = vor.u32 %v2786_v1, %v2492_v2  ;;  %v2634_v12 = vld [vmem:[%s3969_s14 + $0x130] sm:$0xf] }
 0x3f6   :  { %v1513_v36 = vsel %vm3759_vm3, %v3681_v19, %v1509_v11  ;;  %v2671_v19 = vor.u32 %v2830_v30, %v2668_v35  ;;  %v2635_v14 = vor.u32 %v2823_v10, %v2634_v12  ;;  %v2822_v30 = vld [vmem:[%s3969_s14 + $0x134] sm:$0xf] }
 0x3f7   :  { %v1489_v39 = vmul.f32 %v3723_v4, %v1488_v23  ;;  %v1518_v51 = vsel %vm3747_vm2, %v1517_v20, %v1513_v36  ;;  %v2808_v20 = vld [vmem:[%s3969_s14 + $0xc4] sm:$0xf]  ;;  %1911 = vmatpush.bf16.msra.mxu2 %v2495_v5  ;;  %v2627_v36 = vor.u32 %v2821_v32, %v2626_v25  ;;  %v2639_v44 = vor.u32 %v2822_v30, %v2636_v18 }
 0x3f8   :  { %1931 = vmatpush.bf16.msrb.mxu0 %v2671_v19  ;;  %v1541_v3 = vmul.f32 %v1540_v43, %v1518_v51  ;;  %1896 = vmatpush.bf16.msrb.mxu1 %v2635_v14  ;;  %v2583_v23 = vor.u32 %v2808_v20, %v2580_v29  ;;  %v2819_v43 = vld [vmem:[%s3969_s14 + $0x114] sm:$0xf0]  ;;  %v2804_v19 = vld [vmem:[%s3969_s14 + $0xa4] sm:$0xf]  ;;  %v2631_v51 = vor.u32 %v2820_v48, %v2628_v49  ;;  %v1609_v20 = vld [vmem:[%s3970_s15] sm:$0x3] }
 0x3f9   :  { %v1490_v52 = vadd.f32 %v3723_v4, %v1489_v39  ;;  %v2575_v39 = vor.u32 %v2806_v37, %v2572_v38  ;;  %v2567_v50 = vor.u32 %v2804_v19, %v2564_v42  ;;  %v1612_v37 = vperm.slane %v1609_v20, 1  ;;  %s1953_s15 = sshll.u32 %s3971_s16, 4  ;;  %s1954_s15 = int_to_ptr.hbm [resolvable:$true] %s1953_s15 }
 0x3fa   :  { %1921 = vmatpush.bf16.msra.mxu3 %v2583_v23 }
 0x3fb   :  { %v1460_v45 = vpop.f32.mrf.mxu2  ;;  %v1494_v60 = vsel %vm1493_vm6, %v3723_v4, %v1490_v52  ;;  %1912 = vmatpush.bf16.msra.mxu2 %v2487_v27  ;;  %v2610_v52 = vld [vmem:[%s3969_s14 + $0x100] sm:$0xf] }
 0x3fc   :  { %v1467_v24 = vadd.f32 %v1460_v45, %v1217_v46  ;;  %v1499_v28 = vsel %vm1496_vm11, %v1498_v41, %v1494_v60  ;;  %1932 = vmatpush.bf16.msrb.mxu0 %v2663_v57  ;;  %1897 = vmatpush.bf16.msrb.mxu1 %v2627_v36  ;;  %v2619_v46 = vor.u32 %v2819_v43, %v2618_v33  ;;  %v2817_v45 = vld [vmem:[%s3969_s14 + $0x104] sm:$0xf0]  ;;  %v2620_v41 = vld [vmem:[%s3969_s14 + $0x118] sm:$0xf0]  ;;  %v2548_v60 = vld [vmem:[%s3969_s14 + $0x88] sm:$0xf0] }
 0x3fd   :  { %v1542_v4 = vmul.f32 %v2881_v63, %v1499_v28  ;;  %v2611_v53 = vor.u32 %v2817_v45, %v2610_v52  ;;  %v2623_v58 = vor.u32 %v2818_v55, %v2620_v41  ;;  %v2816_v28 = vld [vmem:[%s3969_s14 + $0x104] sm:$0xf]  ;;  %v2551_v2 = vor.u32 %v2800_v59, %v2548_v60 }
 0x3fe   :  { %v1481_v0 = vadd.f32 %v1473_v6, %v1467_v24  ;;  %v2826_v6 = vld [vmem:[%s3969_s14 + $0x154] sm:$0xf]  ;;  %1922 = vmatpush.bf16.msra.mxu3 %v2575_v39  ;;  %v1560_v24 = vld [vmem:[#allocation2 + $0x8] sm:$0xf] }
 0x3ff   :  { %v2655_v11 = vor.u32 %v2826_v6, %v2652_v7  ;;  %v3850_v13 = vadd.f32 %v1542_v4, %v1541_v3  ;;  %v1619_v57 = vunpack.c.l.b16 %v1560_v24 }
 0x400   :  { %v2479_v8 = vmul.f32 -1.442695, %v1481_v0  ;;  %1898 = vmatpush.bf16.msrb.mxu1 %v2619_v46  ;;  %v2612_v0 = vld [vmem:[%s3969_s14 + $0x108] sm:$0xf0] }
 0x401   :  { %1547 = vst [vmem:[#allocation22] sm:$0xff] %v3850_v13  ;;  %1933 = vmatpush.bf16.msrb.mxu0 %v2655_v11  ;;  %v1622_v63 = vpack.c.b16 %v1619_v57, %v1619_v57  ;;  %v2615_v3 = vor.u32 %v2816_v28, %v2612_v0 }
 0x402   :  { %2882 = vpow2.f32 %v2479_v8  ;;  %1923 = vmatpush.bf16.msra.mxu3 %v2567_v50 }
 0x403   :  { %v1462_v26 = vpop.f32.mrf.mxu2 }
 0x404   :  { %1899 = vmatpush.bf16.msrb.mxu1 %v2611_v53  ;;  %v1611_v26 = vperm.slane %v1609_v20, 0 }
 0x405   :  { %1934 = vmatpush.bf16.msrb.mxu0 %v2647_v34 }
 0x406   :  { %1924 = vmatpush.bf16.msra.mxu3 %v2559_v56 }
 0x407   :  { %1900 = vmatmul.bf16.vlgmr.msrb.gmra.mxu1 %v1622_v63 }
 0x408   :  { %v2883_v35 = vpop.eup %2882 }
 0x409   :  { %v1524_v40 = vadd.f32 1.0, %v2883_v35  ;;  %1935 = vmatpush.bf16.msrb.mxu0 %v2639_v44 }
 0x40a   :  { %1925 = vmatpush.bf16.msra.mxu3 %v2551_v2 }
 0x40b   :  { %2884 = vrcp.f32 %v1524_v40  ;;  %v1536_v4 = vand.u32 2147483648, %v1524_v40  ;;  %v1534_v47 = vand.u32 2147483647, %v1524_v40  ;;  %vm1530_vm13 = vweird.f32 %v1524_v40 }
 0x40c   :  { %2886 = vtanh.f32 %v3850_v13 }
 0x40d   :  { %1936 = vmatpush.bf16.msrb.mxu0 %v2631_v51  ;;  %v1537_v7 = vor.u32 1.1754944e-38, %v1536_v4  ;;  %vm1535_vm15 = vcmp.eq.f32.partialorder %v1534_v47, 8.507059e+37 }
 0x411   :  { %v2885_v21 = vpop.eup %2884  ;;  %1937 = vmatpush.bf16.msrb.mxu0 %v2623_v58 }
 0x412   :  { %v1526_v1 = vmul.f32 %v2885_v21, %v1524_v40  ;;  %vm1531_vm12 = vweird.f32 %v2885_v21  ;;  %v2887_v9 = vpop.eup %2886 }
 0x413   :  { %vm1532_vm14 = vmor %vm1530_vm13, %vm1531_vm12 }
 0x414   :  { %v1527_v17 = vsub.f32 1.0, %v1526_v1 }
 0x415   :  { %1938 = vmatpush.bf16.msrb.mxu0 %v2615_v3 }
 0x416   :  { %v1528_v5 = vmul.f32 %v2885_v21, %v1527_v17 }
 0x418   :  { %v1529_v6 = vadd.f32 %v2885_v21, %v1528_v5  ;;  %1939 = vmatmul.bf16.vlgmr.msrb.gmra.mxu0 %v1622_v63 }
 0x41a   :  { %v1533_v8 = vsel %vm1532_vm14, %v2885_v21, %v1529_v6 }
 0x41b   :  { %v1538_v11 = vsel %vm1535_vm15, %v1537_v7, %v1533_v8 }
 0x41c   :  { %v1545_v12 = vmul.f32 %v2887_v9, %v1538_v11 }
 0x41e   :  { %v1548_v10 = vpack.c.bf16 %v1545_v12, %v1545_v12  ;;  %1546 = vst [vmem:[#allocation20] sm:$0xff] %v1545_v12 }
 0x41f   :  { %1967 = dma.vmem_to_hbm [thread:$0]  %s1963_s8, 128, %s1965_s4, [#allocation21]  }
 0x420   :  { %v1551_v14 = vunpack.c.l.b16 %v1548_v10  ;;  %1978 = dma.vmem_to_hbm [thread:$0]  %s1974_s20, 128, %s1976_s27, [#allocation21]  }
 0x422   :  { %v2891_v15 = vpack.c.b16 %v1551_v14, %v1551_v14 }
 0x424   :  { %1874 = vmatmul.bf16.vlgmr.msrb.gmra.mxu3 %v2891_v15  ;;  %1913 = vmatmul.bf16.vlgmr.msra.gmra.mxu2 %v2891_v15 }
 0x434   :  { %1926 = vmatmul.bf16.vlgmr.msra.gmra.mxu3 %v3573_v62 }
 0x463   :  { %v1888_v16 = vpop.f32.mrf.mxu0 }
 0x46b   :  { %v1890_v23 = vpop.f32.mrf.mxu0 }
 0x484   :  { %v1901_v62 = vpop.f32.mrf.mxu1 }
 0x48c   :  { %v1903_v13 = vpop.f32.mrf.mxu1 }
 0x495   :  { %v1940_v36 = vpop.f32.mrf.mxu0 }
 0x49d   :  { %v1942_v39 = vpop.f32.mrf.mxu0 }
 0x4a7   :  { %v1875_v27 = vpop.f32.mrf.mxu3  ;;  %v1914_v22 = vpop.f32.mrf.mxu2 }
 0x4a8   :  { %v1876_v29 = vadd.f32 %v1875_v27, %v1611_v26  ;;  %v1915_v38 = vadd.f32 %v1914_v22, %v1612_v37 }
 0x4aa   :  { %v1889_v31 = vadd.f32 %v1888_v16, %v1876_v29 }
 0x4ac   :  { %v1902_v25 = vadd.f32 %v1901_v62, %v1889_v31 }
 0x4ae   :  { %1944 = vst [vmem:[#allocation19] sm:$0xff] %v1902_v25 }
 0x4af   :  { %v1877_v32 = vpop.f32.mrf.mxu3  ;;  %v1916_v34 = vpop.f32.mrf.mxu2 }
 0x4b7   :  { %v1927_v30 = vpop.f32.mrf.mxu3 }
 0x4b8   :  { %v1928_v35 = vadd.f32 %v1927_v30, %v1915_v38 }
 0x4ba   :  { %v1941_v18 = vadd.f32 %v1940_v36, %v1928_v35 }
 0x4bc   :  { %1945 = vst [vmem:[#allocation19 + $0x8] sm:$0xff] %v1941_v18 }
 0x4bd   :  { %1956 = dma.vmem_to_hbm [thread:$0]  %s1952_s19, 256, %s1954_s15, [#allocation7]  }
 0x4bf   :  { %v1929_v40 = vpop.f32.mrf.mxu3 }
 0x4c0   :  { %3205 = dma.done.wait [#allocation7], 256  }
 0x4c1   :  { %3206 = vsyncadd [#allocation7], 4294967040 }
 0x4c2   :  { %3207 = dma.done.wait [#allocation21], 256  }
 0x4c3   :  { %3208 = vsyncadd [#allocation21], 4294967040 }
 0x4c4   :  { %3209 = dma.done.wait [#allocation24], 128  }
 0x4c5   :  { %3210 = vsyncadd [#allocation24], 4294967168 }
 0x4c6   :  { %2006 = vsyncpa [#allocation6], 1 }
 0x4c7   :  { %2007 = vsyncpa [#allocation9], 1 }
 0x4c8   :  { %2008 = vsyncpa [#allocation12], 1 }
 0x4c9   :  { %2009 = vsyncpa [#allocation15], 1 }
 0x4ca   :  { %2010 = vsyncpa [#allocation18], 1 }
 0x4cb   :  { %2011 = vsyncpa [#allocation7], 1 }
 0x4cc   :  { %2012 = vsyncpa [#allocation21], 1 }
 0x4cd   :  { %2013 = vsyncpa [#allocation24], 1 }

</bundles_post_ra>
